<compile_context>
chip_gen: v5e
topology: v5e:2x2
jax: 0.10.0
libtpu: 0.0.40
codegen_flags: <defaults>
</compile_context>

<pallas_src>
import functools

import jax
import jax.numpy as jnp
import numpy as np
from jax.experimental import pallas as pl
from jax.experimental.pallas import tpu as pltpu

EPS = 1e-5  # PyTorch InstanceNorm2d default
_PARITIES = ((0, 0), (0, 1), (1, 0), (1, 1))  # (oh % 2, ow % 2), pe-major order


def _round_up(a, b):
    return (a + b - 1) // b * b


def _choose_cout_tile(cout, cout_tile=None):
    if cout_tile is None:
        cout_tile = min(128, _round_up(cout, 8))
    return _round_up(int(cout_tile), 8)


def _unet_up_kernel(x_ref, w_ref, m_ref, y_ref, acc_ref, *, count, Wp, Pp_pad):
    # x_ref:   (1, Cin, L)          flattened 1-padded image + shift margin (bf16)
    # w_ref:   (4, 4, ct, Cin)      per (parity group, tap) weight tile (bf16)
    # m_ref:   (1, Pp_pad)          f32 validity mask over the flat padded grid
    # y_ref:   (1, 4, ct, Pp_pad)   output (parity, channel tile, flat spatial), bf16
    # acc_ref: (4, ct, Pp_pad)      f32 scratch: un-normalized conv result
    margin = Wp + 1
    ct = acc_ref.shape[1]
    mask = m_ref[...]                                   # (1, Pp_pad) f32

    s1 = jnp.zeros((ct, 1), jnp.float32)
    s2 = jnp.zeros((ct, 1), jnp.float32)

    # ---- transposed conv: 4 parity groups x 4 dense taps, all on the MXU ----
    for g, (pe, pw) in enumerate(_PARITIES):
        acc = jnp.zeros((ct, Pp_pad), jnp.float32)
        for dr in (0, 1):
            for dc in (0, 1):
                start = margin + (pe + dr - 1) * Wp + (pw + dc - 1)   # static
                xs = x_ref[0, :, start:start + Pp_pad]                # (Cin, Pp_pad)
                wt = w_ref[g, 2 * dr + dc]                            # (ct, Cin)
                acc = acc + jnp.dot(wt, xs, preferred_element_type=jnp.float32)
        acc_ref[g] = acc
        # masked stats while the group's result is still live in vregs
        am = acc * mask                                               # (ct, Pp_pad)
        s1 = s1 + jnp.sum(am, axis=1, keepdims=True)
        s2 = s2 + jnp.sum(am * am, axis=1, keepdims=True)

    # ---- fused InstanceNorm2d (per channel, over the 4*H*W valid pixels) + ReLU ----
    inv_cnt = 1.0 / count
    mean = s1 * inv_cnt                                               # (ct, 1)
    var = s2 * inv_cnt - mean * mean                                  # one-pass variance
    inv = jax.lax.rsqrt(var + EPS)
    for g in range(4):                                                # bounded f32 temps
        y_ref[0, g] = jnp.maximum((acc_ref[g] - mean) * inv, 0.0).astype(y_ref.dtype)


def prepare_unet_up_weight(w, *, cout_tile=None, compute_dtype=jnp.bfloat16):
    """Re-layout ConvTranspose2d weight (Cin, Cout, 4, 4) -> (4, 4, Cout_pad, Cin).

    Call once at parameter-load time and pass the result to unet_up_forward via
    `w_prepared=` to keep the re-layout out of the per-step path.
    """
    Cin, Cout = int(w.shape[0]), int(w.shape[1])
    ct = _choose_cout_tile(Cout, cout_tile)
    Cout_pad = _round_up(Cout, ct)
    taps = []
    for pe, pw in _PARITIES:
        for dr in (0, 1):
            for dc in (0, 1):
                taps.append(jnp.transpose(w[:, :, 3 - pe - 2 * dr, 3 - pw - 2 * dc]))
    ws = jnp.stack(taps).reshape(4, 4, Cout, Cin)
    if Cout_pad != Cout:
        ws = jnp.pad(ws, ((0, 0), (0, 0), (0, Cout_pad - Cout), (0, 0)))
    return ws.astype(compute_dtype)


def unet_up_forward(x, skip, w, *, w_prepared=None, cout_tile=None,
                    compute_dtype=jnp.bfloat16):
    """x: (N, Cin, H, W); skip: (N, Cs, 2H, 2W); w: (Cin, Cout, 4, 4) -> (N, Cout+Cs, 2H, 2W)."""
    N, Cin, H, W = map(int, x.shape)
    Cout = int(w.shape[1])
    out_dtype = x.dtype

    Hp, Wp = H + 2, W + 2
    Pp = Hp * Wp
    Pp_pad = _round_up(Pp, 128)            # lane-dense output blocks (unmasked vst)
    margin = Wp + 1                        # largest |tap shift| in flat padded coords
    L = _round_up(Pp_pad + 2 * margin, 128)

    ct = _choose_cout_tile(Cout, cout_tile)
    Cout_pad = _round_up(Cout, ct)
    n_ct = Cout_pad // ct

    # ---- glue: single pad builds the flattened, margin-shifted, 1-padded image ----
    # Padding rows by (2, rb) and cols by (2, 0) makes flat index (margin + f) hold the
    # 1-zero-padded image's flat position f (row-major over (Hp, Wp)).
    rb = max(2, -(-L // Wp) - (H + 2))
    xp = jnp.pad(x.astype(compute_dtype), ((0, 0), (0, 0), (2, rb), (2, 0)))
    x_flat = xp.reshape(N, Cin, -1)[:, :, :L]                        # (N, Cin, L)

    if w_prepared is None:
        w_prepared = prepare_unet_up_weight(w, cout_tile=cout_tile,
                                            compute_dtype=compute_dtype)
    w_stack = w_prepared                                             # (4, 4, Cout_pad, Cin)

    # validity mask (pad rows/cols and the lane-rounding tail excluded from the norm)
    idx = jnp.arange(Pp_pad, dtype=jnp.int32)
    ri, si = idx // Wp, idx % Wp
    mask = (((ri >= 1) & (ri <= H) & (si >= 1) & (si <= W) & (idx < Pp))
            .astype(jnp.float32).reshape(1, Pp_pad))

    # ---- VMEM budget (double-buffered ins/outs + scratch + headroom for temps) ----
    esize = jnp.dtype(compute_dtype).itemsize
    bytes_in = Cin * L * esize
    bytes_w = 16 * Cout_pad * Cin * esize
    bytes_mask = Pp_pad * 4
    bytes_out = 4 * ct * Pp_pad * esize
    bytes_scratch = 4 * ct * Pp_pad * 4
    vmem_limit = int(min(2 * (bytes_in + bytes_w + bytes_mask + bytes_out)
                         + 3 * bytes_scratch + (16 << 20), 127 << 20))

    kernel = functools.partial(_unet_up_kernel, count=float(4 * H * W),
                               Wp=Wp, Pp_pad=Pp_pad)
    y = pl.pallas_call(
        kernel,
        out_shape=jax.ShapeDtypeStruct((N, 4, Cout_pad, Pp_pad), compute_dtype),
        grid_spec=pltpu.PrefetchScalarGridSpec(
            num_scalar_prefetch=0,
            grid=(N, n_ct),
            in_specs=[
                pl.BlockSpec((1, Cin, L), lambda n, c: (n, 0, 0)),
                pl.BlockSpec((4, 4, ct, Cin), lambda n, c: (0, 0, c, 0)),
                pl.BlockSpec((1, Pp_pad), lambda n, c: (0, 0)),
            ],
            out_specs=pl.BlockSpec((1, 4, ct, Pp_pad), lambda n, c: (n, 0, c, 0)),
            scratch_shapes=[pltpu.VMEM((4, ct, Pp_pad), jnp.float32)],
        ),
        compiler_params=pltpu.CompilerParams(
            dimension_semantics=("parallel", "parallel"),
            vmem_limit_bytes=vmem_limit,
        ),
    )(x_flat, w_stack, mask)

    # ---- glue: drop pad/rounding, interleave parities back to NCHW, concat skip ----
    y = y[:, :, :Cout, :Pp].reshape(N, 2, 2, Cout, Hp, Wp)[:, :, :, :, 1:H + 1, 1:W + 1]
    y = jnp.transpose(y, (0, 3, 4, 1, 5, 2)).reshape(N, Cout, 2 * H, 2 * W)
    y = y.astype(out_dtype)
    # TODO(synk): the stride-2 parity interleave + channel concat stay as XLA glue
    #             (one copy); not expressible as a BlockSpec write.
    return jnp.concatenate([y, skip.astype(out_dtype)], axis=1)


def unet_up_reference(x, skip, w):
    """Pure-JAX reference (direct scatter formulation of ConvTranspose2d)."""
    N, Cin, H, W = x.shape
    Cout = w.shape[1]
    yf = jnp.zeros((N, Cout, 2 * H + 2, 2 * W + 2), jnp.float32)
    for kh in range(4):
        for kw in range(4):
            contrib = jnp.einsum('nchw,cd->ndhw', x, w[:, :, kh, kw])
            yf = yf.at[:, :, kh:kh + 2 * H:2, kw:kw + 2 * W:2].add(contrib)
    y = yf[:, :, 1:2 * H + 1, 1:2 * W + 1]
    mean = y.mean(axis=(2, 3), keepdims=True)
    var = jnp.square(y - mean).mean(axis=(2, 3), keepdims=True)
    y = jnp.maximum((y - mean) * jax.lax.rsqrt(var + EPS), 0.0)
    return jnp.concatenate([y, skip], axis=1)


if __name__ == "__main__":
    # small shapes: batch=2, input_nc=4, dec_nc=8, spatial 16x16 -> 32x32
    N, Cin, Cout, H, W = 2, 4, 8, 16, 16
    Cskip = 8  # skip connection channel count (typical U-Net: == dec_nc)

    key = jax.random.PRNGKey(0)
    kx, ks, kw = jax.random.split(key, 3)
    x = jax.random.normal(kx, (N, Cin, H, W), dtype=jnp.float32)
    skip = jax.random.normal(ks, (N, Cskip, 2 * H, 2 * W), dtype=jnp.float32)
    # ConvTranspose2d weight: (in_channels, out_channels, 4, 4), no bias
    w = 0.05 * jax.random.normal(kw, (Cin, Cout, 4, 4), dtype=jnp.float32)

    # weight re-layout hoisted out of the per-call path
    w_prep = prepare_unet_up_weight(w)
    out = jax.block_until_ready(unet_up_forward(x, skip, w, w_prepared=w_prep))

    # Reference sees the same bf16-rounded operands that the MXU sees; the kernel
    # additionally emits bf16 activations (per perf review), so tolerances cover
    # one bf16 rounding of the normalized output.
    xq = x.astype(jnp.bfloat16).astype(jnp.float32)
    wq = w.astype(jnp.bfloat16).astype(jnp.float32)
    ref = jax.block_until_ready(unet_up_reference(xq, skip, wq))

    assert out.shape == (N, Cout + Cskip, 2 * H, 2 * W), out.shape
    np.testing.assert_allclose(np.asarray(out), np.asarray(ref), rtol=2e-2, atol=2e-2)
    print("KERNEL_OK")
</pallas_src>

<mosaic_0001>
module attributes {stable_mosaic.version = 11 : i64} {
  func.func @_unet_up_kernel(%arg0: i32, %arg1: i32, %arg2: memref<1x4x512xbf16, #tpu.memory_space<vmem>>, %arg3: memref<4x4x8x4xbf16, #tpu.memory_space<vmem>>, %arg4: memref<1x384xf32, #tpu.memory_space<vmem>>, %arg5: memref<1x4x8x384xbf16, #tpu.memory_space<vmem>>, %arg6: memref<4x8x384xf32, #tpu.memory_space<vmem>>) attributes {dimension_semantics = [#tpu.dimension_semantics<parallel>, #tpu.dimension_semantics<parallel>], iteration_bounds = array<i64: 2, 1>, scalar_prefetch = 0 : i64, scratch_operands = 1 : i64, tpu.core_type = #tpu.core_type<tc>, window_params = [{transform_indices = @transform_0, window_bounds = array<i64: 1, 4, 512>}, {transform_indices = @transform_1, window_bounds = array<i64: 4, 4, 8, 4>}, {pipeline_mode = #tpu.pipeline_mode<synchronous>, transform_indices = @transform_2, window_bounds = array<i64: 1, 384>}, {transform_indices = @transform_3, window_bounds = array<i64: 1, 4, 8, 384>}]} {
    %c0 = arith.constant 0 : index
    %c0_0 = arith.constant 0 : index
    %0 = vector.load %arg4[%c0, %c0_0] : memref<1x384xf32, #tpu.memory_space<vmem>>, vector<1x384xf32>
    %cst = arith.constant 0.000000e+00 : f32
    %1 = vector.broadcast %cst : f32 to vector<8x1xf32>
    %cst_1 = arith.constant 0.000000e+00 : f32
    %2 = vector.broadcast %cst_1 : f32 to vector<8x1xf32>
    %cst_2 = arith.constant 0.000000e+00 : f32
    %3 = vector.broadcast %cst_2 : f32 to vector<8x384xf32>
    %c0_3 = arith.constant 0 : index
    %c0_4 = arith.constant 0 : index
    %c0_5 = arith.constant 0 : index
    %4 = vector.load %arg2[%c0_3, %c0_4, %c0_5] : memref<1x4x512xbf16, #tpu.memory_space<vmem>>, vector<1x4x384xbf16>
    %5 = vector.shape_cast %4 : vector<1x4x384xbf16> to vector<4x384xbf16>
    %c0_6 = arith.constant 0 : index
    %c0_7 = arith.constant 0 : index
    %c0_8 = arith.constant 0 : index
    %c0_9 = arith.constant 0 : index
    %6 = vector.load %arg3[%c0_6, %c0_7, %c0_8, %c0_9] : memref<4x4x8x4xbf16, #tpu.memory_space<vmem>>, vector<1x1x8x4xbf16>
    %7 = vector.shape_cast %6 : vector<1x1x8x4xbf16> to vector<8x4xbf16>
    %cst_10 = arith.constant dense<0.000000e+00> : vector<8x384xf32>
    %8 = tpu.matmul %7, %5, %cst_10 {dimension_numbers = #tpu.dot_dimension_numbers<[1], [0], [0], [1], [0, 0, 1, 1], [], []>} : vector<8x4xbf16>, vector<4x384xbf16>, vector<8x384xf32> -> vector<8x384xf32>
    %9 = arith.addf %3, %8 : vector<8x384xf32>
    %c0_11 = arith.constant 0 : index
    %c0_12 = arith.constant 0 : index
    %c1 = arith.constant 1 : index
    %10 = vector.load %arg2[%c0_11, %c0_12, %c1] : memref<1x4x512xbf16, #tpu.memory_space<vmem>>, vector<1x4x384xbf16>
    %11 = vector.shape_cast %10 : vector<1x4x384xbf16> to vector<4x384xbf16>
    %c0_13 = arith.constant 0 : index
    %c1_14 = arith.constant 1 : index
    %c0_15 = arith.constant 0 : index
    %c0_16 = arith.constant 0 : index
    %12 = vector.load %arg3[%c0_13, %c1_14, %c0_15, %c0_16] : memref<4x4x8x4xbf16, #tpu.memory_space<vmem>>, vector<1x1x8x4xbf16>
    %13 = vector.shape_cast %12 : vector<1x1x8x4xbf16> to vector<8x4xbf16>
    %cst_17 = arith.constant dense<0.000000e+00> : vector<8x384xf32>
    %14 = tpu.matmul %13, %11, %cst_17 {dimension_numbers = #tpu.dot_dimension_numbers<[1], [0], [0], [1], [0, 0, 1, 1], [], []>} : vector<8x4xbf16>, vector<4x384xbf16>, vector<8x384xf32> -> vector<8x384xf32>
    %15 = arith.addf %9, %14 : vector<8x384xf32>
    %c0_18 = arith.constant 0 : index
    %c0_19 = arith.constant 0 : index
    %c18 = arith.constant 18 : index
    %16 = vector.load %arg2[%c0_18, %c0_19, %c18] : memref<1x4x512xbf16, #tpu.memory_space<vmem>>, vector<1x4x384xbf16>
    %17 = vector.shape_cast %16 : vector<1x4x384xbf16> to vector<4x384xbf16>
    %c0_20 = arith.constant 0 : index
    %c2 = arith.constant 2 : index
    %c0_21 = arith.constant 0 : index
    %c0_22 = arith.constant 0 : index
    %18 = vector.load %arg3[%c0_20, %c2, %c0_21, %c0_22] : memref<4x4x8x4xbf16, #tpu.memory_space<vmem>>, vector<1x1x8x4xbf16>
    %19 = vector.shape_cast %18 : vector<1x1x8x4xbf16> to vector<8x4xbf16>
    %cst_23 = arith.constant dense<0.000000e+00> : vector<8x384xf32>
    %20 = tpu.matmul %19, %17, %cst_23 {dimension_numbers = #tpu.dot_dimension_numbers<[1], [0], [0], [1], [0, 0, 1, 1], [], []>} : vector<8x4xbf16>, vector<4x384xbf16>, vector<8x384xf32> -> vector<8x384xf32>
    %21 = arith.addf %15, %20 : vector<8x384xf32>
    %c0_24 = arith.constant 0 : index
    %c0_25 = arith.constant 0 : index
    %c19 = arith.constant 19 : index
    %22 = vector.load %arg2[%c0_24, %c0_25, %c19] : memref<1x4x512xbf16, #tpu.memory_space<vmem>>, vector<1x4x384xbf16>
    %23 = vector.shape_cast %22 : vector<1x4x384xbf16> to vector<4x384xbf16>
    %c0_26 = arith.constant 0 : index
    %c3 = arith.constant 3 : index
    %c0_27 = arith.constant 0 : index
    %c0_28 = arith.constant 0 : index
    %24 = vector.load %arg3[%c0_26, %c3, %c0_27, %c0_28] : memref<4x4x8x4xbf16, #tpu.memory_space<vmem>>, vector<1x1x8x4xbf16>
    %25 = vector.shape_cast %24 : vector<1x1x8x4xbf16> to vector<8x4xbf16>
    %cst_29 = arith.constant dense<0.000000e+00> : vector<8x384xf32>
    %26 = tpu.matmul %25, %23, %cst_29 {dimension_numbers = #tpu.dot_dimension_numbers<[1], [0], [0], [1], [0, 0, 1, 1], [], []>} : vector<8x4xbf16>, vector<4x384xbf16>, vector<8x384xf32> -> vector<8x384xf32>
    %27 = arith.addf %21, %26 : vector<8x384xf32>
    %c0_30 = arith.constant 0 : index
    %c0_31 = arith.constant 0 : index
    %c0_32 = arith.constant 0 : index
    %28 = vector.load %arg6[%c0_30, %c0_31, %c0_32] : memref<4x8x384xf32, #tpu.memory_space<vmem>>, vector<1x8x384xf32>
    %29 = vector.shape_cast %28 : vector<1x8x384xf32> to vector<8x384xf32>
    %30 = vector.shape_cast %27 : vector<8x384xf32> to vector<1x8x384xf32>
    tpu.vector_store %arg6[%c0_30, %c0_31, %c0_32], %30 {strides = array<i32>} : memref<4x8x384xf32, #tpu.memory_space<vmem>>, vector<1x8x384xf32>,
    %31 = vector.broadcast %0 : vector<1x384xf32> to vector<8x384xf32>
    %32 = arith.mulf %27, %31 : vector<8x384xf32>
    %cst_33 = arith.constant dense<0.000000e+00> : vector<8xf32>
    %33 = vector.multi_reduction <add>, %32, %cst_33 [1] : vector<8x384xf32> to vector<8xf32>
    %34 = vector.shape_cast %33 : vector<8xf32> to vector<8x1xf32>
    %35 = arith.addf %1, %34 : vector<8x1xf32>
    %36 = arith.mulf %32, %32 : vector<8x384xf32>
    %cst_34 = arith.constant dense<0.000000e+00> : vector<8xf32>
    %37 = vector.multi_reduction <add>, %36, %cst_34 [1] : vector<8x384xf32> to vector<8xf32>
    %38 = vector.shape_cast %37 : vector<8xf32> to vector<8x1xf32>
    %39 = arith.addf %2, %38 : vector<8x1xf32>
    %cst_35 = arith.constant 0.000000e+00 : f32
    %40 = vector.broadcast %cst_35 : f32 to vector<8x384xf32>
    %c0_36 = arith.constant 0 : index
    %c0_37 = arith.constant 0 : index
    %c1_38 = arith.constant 1 : index
    %41 = vector.load %arg2[%c0_36, %c0_37, %c1_38] : memref<1x4x512xbf16, #tpu.memory_space<vmem>>, vector<1x4x384xbf16>
    %42 = vector.shape_cast %41 : vector<1x4x384xbf16> to vector<4x384xbf16>
    %c1_39 = arith.constant 1 : index
    %c0_40 = arith.constant 0 : index
    %c0_41 = arith.constant 0 : index
    %c0_42 = arith.constant 0 : index
    %43 = vector.load %arg3[%c1_39, %c0_40, %c0_41, %c0_42] : memref<4x4x8x4xbf16, #tpu.memory_space<vmem>>, vector<1x1x8x4xbf16>
    %44 = vector.shape_cast %43 : vector<1x1x8x4xbf16> to vector<8x4xbf16>
    %cst_43 = arith.constant dense<0.000000e+00> : vector<8x384xf32>
    %45 = tpu.matmul %44, %42, %cst_43 {dimension_numbers = #tpu.dot_dimension_numbers<[1], [0], [0], [1], [0, 0, 1, 1], [], []>} : vector<8x4xbf16>, vector<4x384xbf16>, vector<8x384xf32> -> vector<8x384xf32>
    %46 = arith.addf %40, %45 : vector<8x384xf32>
    %c0_44 = arith.constant 0 : index
    %c0_45 = arith.constant 0 : index
    %c2_46 = arith.constant 2 : index
    %47 = vector.load %arg2[%c0_44, %c0_45, %c2_46] : memref<1x4x512xbf16, #tpu.memory_space<vmem>>, vector<1x4x384xbf16>
    %48 = vector.shape_cast %47 : vector<1x4x384xbf16> to vector<4x384xbf16>
    %c1_47 = arith.constant 1 : index
    %c1_48 = arith.constant 1 : index
    %c0_49 = arith.constant 0 : index
    %c0_50 = arith.constant 0 : index
    %49 = vector.load %arg3[%c1_47, %c1_48, %c0_49, %c0_50] : memref<4x4x8x4xbf16, #tpu.memory_space<vmem>>, vector<1x1x8x4xbf16>
    %50 = vector.shape_cast %49 : vector<1x1x8x4xbf16> to vector<8x4xbf16>
    %cst_51 = arith.constant dense<0.000000e+00> : vector<8x384xf32>
    %51 = tpu.matmul %50, %48, %cst_51 {dimension_numbers = #tpu.dot_dimension_numbers<[1], [0], [0], [1], [0, 0, 1, 1], [], []>} : vector<8x4xbf16>, vector<4x384xbf16>, vector<8x384xf32> -> vector<8x384xf32>
    %52 = arith.addf %46, %51 : vector<8x384xf32>
    %c0_52 = arith.constant 0 : index
    %c0_53 = arith.constant 0 : index
    %c19_54 = arith.constant 19 : index
    %53 = vector.load %arg2[%c0_52, %c0_53, %c19_54] : memref<1x4x512xbf16, #tpu.memory_space<vmem>>, vector<1x4x384xbf16>
    %54 = vector.shape_cast %53 : vector<1x4x384xbf16> to vector<4x384xbf16>
    %c1_55 = arith.constant 1 : index
    %c2_56 = arith.constant 2 : index
    %c0_57 = arith.constant 0 : index
    %c0_58 = arith.constant 0 : index
    %55 = vector.load %arg3[%c1_55, %c2_56, %c0_57, %c0_58] : memref<4x4x8x4xbf16, #tpu.memory_space<vmem>>, vector<1x1x8x4xbf16>
    %56 = vector.shape_cast %55 : vector<1x1x8x4xbf16> to vector<8x4xbf16>
    %cst_59 = arith.constant dense<0.000000e+00> : vector<8x384xf32>
    %57 = tpu.matmul %56, %54, %cst_59 {dimension_numbers = #tpu.dot_dimension_numbers<[1], [0], [0], [1], [0, 0, 1, 1], [], []>} : vector<8x4xbf16>, vector<4x384xbf16>, vector<8x384xf32> -> vector<8x384xf32>
    %58 = arith.addf %52, %57 : vector<8x384xf32>
    %c0_60 = arith.constant 0 : index
    %c0_61 = arith.constant 0 : index
    %c20 = arith.constant 20 : index
    %59 = vector.load %arg2[%c0_60, %c0_61, %c20] : memref<1x4x512xbf16, #tpu.memory_space<vmem>>, vector<1x4x384xbf16>
    %60 = vector.shape_cast %59 : vector<1x4x384xbf16> to vector<4x384xbf16>
    %c1_62 = arith.constant 1 : index
    %c3_63 = arith.constant 3 : index
    %c0_64 = arith.constant 0 : index
    %c0_65 = arith.constant 0 : index
    %61 = vector.load %arg3[%c1_62, %c3_63, %c0_64, %c0_65] : memref<4x4x8x4xbf16, #tpu.memory_space<vmem>>, vector<1x1x8x4xbf16>
    %62 = vector.shape_cast %61 : vector<1x1x8x4xbf16> to vector<8x4xbf16>
    %cst_66 = arith.constant dense<0.000000e+00> : vector<8x384xf32>
    %63 = tpu.matmul %62, %60, %cst_66 {dimension_numbers = #tpu.dot_dimension_numbers<[1], [0], [0], [1], [0, 0, 1, 1], [], []>} : vector<8x4xbf16>, vector<4x384xbf16>, vector<8x384xf32> -> vector<8x384xf32>
    %64 = arith.addf %58, %63 : vector<8x384xf32>
    %c1_67 = arith.constant 1 : index
    %c0_68 = arith.constant 0 : index
    %c0_69 = arith.constant 0 : index
    %65 = vector.load %arg6[%c1_67, %c0_68, %c0_69] : memref<4x8x384xf32, #tpu.memory_space<vmem>>, vector<1x8x384xf32>
    %66 = vector.shape_cast %65 : vector<1x8x384xf32> to vector<8x384xf32>
    %67 = vector.shape_cast %64 : vector<8x384xf32> to vector<1x8x384xf32>
    tpu.vector_store %arg6[%c1_67, %c0_68, %c0_69], %67 {strides = array<i32>} : memref<4x8x384xf32, #tpu.memory_space<vmem>>, vector<1x8x384xf32>,
    %68 = vector.broadcast %0 : vector<1x384xf32> to vector<8x384xf32>
    %69 = arith.mulf %64, %68 : vector<8x384xf32>
    %cst_70 = arith.constant dense<0.000000e+00> : vector<8xf32>
    %70 = vector.multi_reduction <add>, %69, %cst_70 [1] : vector<8x384xf32> to vector<8xf32>
    %71 = vector.shape_cast %70 : vector<8xf32> to vector<8x1xf32>
    %72 = arith.addf %35, %71 : vector<8x1xf32>
    %73 = arith.mulf %69, %69 : vector<8x384xf32>
    %cst_71 = arith.constant dense<0.000000e+00> : vector<8xf32>
    %74 = vector.multi_reduction <add>, %73, %cst_71 [1] : vector<8x384xf32> to vector<8xf32>
    %75 = vector.shape_cast %74 : vector<8xf32> to vector<8x1xf32>
    %76 = arith.addf %39, %75 : vector<8x1xf32>
    %cst_72 = arith.constant 0.000000e+00 : f32
    %77 = vector.broadcast %cst_72 : f32 to vector<8x384xf32>
    %c0_73 = arith.constant 0 : index
    %c0_74 = arith.constant 0 : index
    %c18_75 = arith.constant 18 : index
    %78 = vector.load %arg2[%c0_73, %c0_74, %c18_75] : memref<1x4x512xbf16, #tpu.memory_space<vmem>>, vector<1x4x384xbf16>
    %79 = vector.shape_cast %78 : vector<1x4x384xbf16> to vector<4x384xbf16>
    %c2_76 = arith.constant 2 : index
    %c0_77 = arith.constant 0 : index
    %c0_78 = arith.constant 0 : index
    %c0_79 = arith.constant 0 : index
    %80 = vector.load %arg3[%c2_76, %c0_77, %c0_78, %c0_79] : memref<4x4x8x4xbf16, #tpu.memory_space<vmem>>, vector<1x1x8x4xbf16>
    %81 = vector.shape_cast %80 : vector<1x1x8x4xbf16> to vector<8x4xbf16>
    %cst_80 = arith.constant dense<0.000000e+00> : vector<8x384xf32>
    %82 = tpu.matmul %81, %79, %cst_80 {dimension_numbers = #tpu.dot_dimension_numbers<[1], [0], [0], [1], [0, 0, 1, 1], [], []>} : vector<8x4xbf16>, vector<4x384xbf16>, vector<8x384xf32> -> vector<8x384xf32>
    %83 = arith.addf %77, %82 : vector<8x384xf32>
    %c0_81 = arith.constant 0 : index
    %c0_82 = arith.constant 0 : index
    %c19_83 = arith.constant 19 : index
    %84 = vector.load %arg2[%c0_81, %c0_82, %c19_83] : memref<1x4x512xbf16, #tpu.memory_space<vmem>>, vector<1x4x384xbf16>
    %85 = vector.shape_cast %84 : vector<1x4x384xbf16> to vector<4x384xbf16>
    %c2_84 = arith.constant 2 : index
    %c1_85 = arith.constant 1 : index
    %c0_86 = arith.constant 0 : index
    %c0_87 = arith.constant 0 : index
    %86 = vector.load %arg3[%c2_84, %c1_85, %c0_86, %c0_87] : memref<4x4x8x4xbf16, #tpu.memory_space<vmem>>, vector<1x1x8x4xbf16>
    %87 = vector.shape_cast %86 : vector<1x1x8x4xbf16> to vector<8x4xbf16>
    %cst_88 = arith.constant dense<0.000000e+00> : vector<8x384xf32>
    %88 = tpu.matmul %87, %85, %cst_88 {dimension_numbers = #tpu.dot_dimension_numbers<[1], [0], [0], [1], [0, 0, 1, 1], [], []>} : vector<8x4xbf16>, vector<4x384xbf16>, vector<8x384xf32> -> vector<8x384xf32>
    %89 = arith.addf %83, %88 : vector<8x384xf32>
    %c0_89 = arith.constant 0 : index
    %c0_90 = arith.constant 0 : index
    %c36 = arith.constant 36 : index
    %90 = vector.load %arg2[%c0_89, %c0_90, %c36] : memref<1x4x512xbf16, #tpu.memory_space<vmem>>, vector<1x4x384xbf16>
    %91 = vector.shape_cast %90 : vector<1x4x384xbf16> to vector<4x384xbf16>
    %c2_91 = arith.constant 2 : index
    %c2_92 = arith.constant 2 : index
    %c0_93 = arith.constant 0 : index
    %c0_94 = arith.constant 0 : index
    %92 = vector.load %arg3[%c2_91, %c2_92, %c0_93, %c0_94] : memref<4x4x8x4xbf16, #tpu.memory_space<vmem>>, vector<1x1x8x4xbf16>
    %93 = vector.shape_cast %92 : vector<1x1x8x4xbf16> to vector<8x4xbf16>
    %cst_95 = arith.constant dense<0.000000e+00> : vector<8x384xf32>
    %94 = tpu.matmul %93, %91, %cst_95 {dimension_numbers = #tpu.dot_dimension_numbers<[1], [0], [0], [1], [0, 0, 1, 1], [], []>} : vector<8x4xbf16>, vector<4x384xbf16>, vector<8x384xf32> -> vector<8x384xf32>
    %95 = arith.addf %89, %94 : vector<8x384xf32>
    %c0_96 = arith.constant 0 : index
    %c0_97 = arith.constant 0 : index
    %c37 = arith.constant 37 : index
    %96 = vector.load %arg2[%c0_96, %c0_97, %c37] : memref<1x4x512xbf16, #tpu.memory_space<vmem>>, vector<1x4x384xbf16>
    %97 = vector.shape_cast %96 : vector<1x4x384xbf16> to vector<4x384xbf16>
    %c2_98 = arith.constant 2 : index
    %c3_99 = arith.constant 3 : index
    %c0_100 = arith.constant 0 : index
    %c0_101 = arith.constant 0 : index
    %98 = vector.load %arg3[%c2_98, %c3_99, %c0_100, %c0_101] : memref<4x4x8x4xbf16, #tpu.memory_space<vmem>>, vector<1x1x8x4xbf16>
    %99 = vector.shape_cast %98 : vector<1x1x8x4xbf16> to vector<8x4xbf16>
    %cst_102 = arith.constant dense<0.000000e+00> : vector<8x384xf32>
    %100 = tpu.matmul %99, %97, %cst_102 {dimension_numbers = #tpu.dot_dimension_numbers<[1], [0], [0], [1], [0, 0, 1, 1], [], []>} : vector<8x4xbf16>, vector<4x384xbf16>, vector<8x384xf32> -> vector<8x384xf32>
    %101 = arith.addf %95, %100 : vector<8x384xf32>
    %c2_103 = arith.constant 2 : index
    %c0_104 = arith.constant 0 : index
    %c0_105 = arith.constant 0 : index
    %102 = vector.load %arg6[%c2_103, %c0_104, %c0_105] : memref<4x8x384xf32, #tpu.memory_space<vmem>>, vector<1x8x384xf32>
    %103 = vector.shape_cast %102 : vector<1x8x384xf32> to vector<8x384xf32>
    %104 = vector.shape_cast %101 : vector<8x384xf32> to vector<1x8x384xf32>
    tpu.vector_store %arg6[%c2_103, %c0_104, %c0_105], %104 {strides = array<i32>} : memref<4x8x384xf32, #tpu.memory_space<vmem>>, vector<1x8x384xf32>,
    %105 = vector.broadcast %0 : vector<1x384xf32> to vector<8x384xf32>
    %106 = arith.mulf %101, %105 : vector<8x384xf32>
    %cst_106 = arith.constant dense<0.000000e+00> : vector<8xf32>
    %107 = vector.multi_reduction <add>, %106, %cst_106 [1] : vector<8x384xf32> to vector<8xf32>
    %108 = vector.shape_cast %107 : vector<8xf32> to vector<8x1xf32>
    %109 = arith.addf %72, %108 : vector<8x1xf32>
    %110 = arith.mulf %106, %106 : vector<8x384xf32>
    %cst_107 = arith.constant dense<0.000000e+00> : vector<8xf32>
    %111 = vector.multi_reduction <add>, %110, %cst_107 [1] : vector<8x384xf32> to vector<8xf32>
    %112 = vector.shape_cast %111 : vector<8xf32> to vector<8x1xf32>
    %113 = arith.addf %76, %112 : vector<8x1xf32>
    %cst_108 = arith.constant 0.000000e+00 : f32
    %114 = vector.broadcast %cst_108 : f32 to vector<8x384xf32>
    %c0_109 = arith.constant 0 : index
    %c0_110 = arith.constant 0 : index
    %c19_111 = arith.constant 19 : index
    %115 = vector.load %arg2[%c0_109, %c0_110, %c19_111] : memref<1x4x512xbf16, #tpu.memory_space<vmem>>, vector<1x4x384xbf16>
    %116 = vector.shape_cast %115 : vector<1x4x384xbf16> to vector<4x384xbf16>
    %c3_112 = arith.constant 3 : index
    %c0_113 = arith.constant 0 : index
    %c0_114 = arith.constant 0 : index
    %c0_115 = arith.constant 0 : index
    %117 = vector.load %arg3[%c3_112, %c0_113, %c0_114, %c0_115] : memref<4x4x8x4xbf16, #tpu.memory_space<vmem>>, vector<1x1x8x4xbf16>
    %118 = vector.shape_cast %117 : vector<1x1x8x4xbf16> to vector<8x4xbf16>
    %cst_116 = arith.constant dense<0.000000e+00> : vector<8x384xf32>
    %119 = tpu.matmul %118, %116, %cst_116 {dimension_numbers = #tpu.dot_dimension_numbers<[1], [0], [0], [1], [0, 0, 1, 1], [], []>} : vector<8x4xbf16>, vector<4x384xbf16>, vector<8x384xf32> -> vector<8x384xf32>
    %120 = arith.addf %114, %119 : vector<8x384xf32>
    %c0_117 = arith.constant 0 : index
    %c0_118 = arith.constant 0 : index
    %c20_119 = arith.constant 20 : index
    %121 = vector.load %arg2[%c0_117, %c0_118, %c20_119] : memref<1x4x512xbf16, #tpu.memory_space<vmem>>, vector<1x4x384xbf16>
    %122 = vector.shape_cast %121 : vector<1x4x384xbf16> to vector<4x384xbf16>
    %c3_120 = arith.constant 3 : index
    %c1_121 = arith.constant 1 : index
    %c0_122 = arith.constant 0 : index
    %c0_123 = arith.constant 0 : index
    %123 = vector.load %arg3[%c3_120, %c1_121, %c0_122, %c0_123] : memref<4x4x8x4xbf16, #tpu.memory_space<vmem>>, vector<1x1x8x4xbf16>
    %124 = vector.shape_cast %123 : vector<1x1x8x4xbf16> to vector<8x4xbf16>
    %cst_124 = arith.constant dense<0.000000e+00> : vector<8x384xf32>
    %125 = tpu.matmul %124, %122, %cst_124 {dimension_numbers = #tpu.dot_dimension_numbers<[1], [0], [0], [1], [0, 0, 1, 1], [], []>} : vector<8x4xbf16>, vector<4x384xbf16>, vector<8x384xf32> -> vector<8x384xf32>
    %126 = arith.addf %120, %125 : vector<8x384xf32>
    %c0_125 = arith.constant 0 : index
    %c0_126 = arith.constant 0 : index
    %c37_127 = arith.constant 37 : index
    %127 = vector.load %arg2[%c0_125, %c0_126, %c37_127] : memref<1x4x512xbf16, #tpu.memory_space<vmem>>, vector<1x4x384xbf16>
    %128 = vector.shape_cast %127 : vector<1x4x384xbf16> to vector<4x384xbf16>
    %c3_128 = arith.constant 3 : index
    %c2_129 = arith.constant 2 : index
    %c0_130 = arith.constant 0 : index
    %c0_131 = arith.constant 0 : index
    %129 = vector.load %arg3[%c3_128, %c2_129, %c0_130, %c0_131] : memref<4x4x8x4xbf16, #tpu.memory_space<vmem>>, vector<1x1x8x4xbf16>
    %130 = vector.shape_cast %129 : vector<1x1x8x4xbf16> to vector<8x4xbf16>
    %cst_132 = arith.constant dense<0.000000e+00> : vector<8x384xf32>
    %131 = tpu.matmul %130, %128, %cst_132 {dimension_numbers = #tpu.dot_dimension_numbers<[1], [0], [0], [1], [0, 0, 1, 1], [], []>} : vector<8x4xbf16>, vector<4x384xbf16>, vector<8x384xf32> -> vector<8x384xf32>
    %132 = arith.addf %126, %131 : vector<8x384xf32>
    %c0_133 = arith.constant 0 : index
    %c0_134 = arith.constant 0 : index
    %c38 = arith.constant 38 : index
    %133 = vector.load %arg2[%c0_133, %c0_134, %c38] : memref<1x4x512xbf16, #tpu.memory_space<vmem>>, vector<1x4x384xbf16>
    %134 = vector.shape_cast %133 : vector<1x4x384xbf16> to vector<4x384xbf16>
    %c3_135 = arith.constant 3 : index
    %c3_136 = arith.constant 3 : index
    %c0_137 = arith.constant 0 : index
    %c0_138 = arith.constant 0 : index
    %135 = vector.load %arg3[%c3_135, %c3_136, %c0_137, %c0_138] : memref<4x4x8x4xbf16, #tpu.memory_space<vmem>>, vector<1x1x8x4xbf16>
    %136 = vector.shape_cast %135 : vector<1x1x8x4xbf16> to vector<8x4xbf16>
    %cst_139 = arith.constant dense<0.000000e+00> : vector<8x384xf32>
    %137 = tpu.matmul %136, %134, %cst_139 {dimension_numbers = #tpu.dot_dimension_numbers<[1], [0], [0], [1], [0, 0, 1, 1], [], []>} : vector<8x4xbf16>, vector<4x384xbf16>, vector<8x384xf32> -> vector<8x384xf32>
    %138 = arith.addf %132, %137 : vector<8x384xf32>
    %c3_140 = arith.constant 3 : index
    %c0_141 = arith.constant 0 : index
    %c0_142 = arith.constant 0 : index
    %139 = vector.load %arg6[%c3_140, %c0_141, %c0_142] : memref<4x8x384xf32, #tpu.memory_space<vmem>>, vector<1x8x384xf32>
    %140 = vector.shape_cast %139 : vector<1x8x384xf32> to vector<8x384xf32>
    %141 = vector.shape_cast %138 : vector<8x384xf32> to vector<1x8x384xf32>
    tpu.vector_store %arg6[%c3_140, %c0_141, %c0_142], %141 {strides = array<i32>} : memref<4x8x384xf32, #tpu.memory_space<vmem>>, vector<1x8x384xf32>,
    %142 = vector.broadcast %0 : vector<1x384xf32> to vector<8x384xf32>
    %143 = arith.mulf %138, %142 : vector<8x384xf32>
    %cst_143 = arith.constant dense<0.000000e+00> : vector<8xf32>
    %144 = vector.multi_reduction <add>, %143, %cst_143 [1] : vector<8x384xf32> to vector<8xf32>
    %145 = vector.shape_cast %144 : vector<8xf32> to vector<8x1xf32>
    %146 = arith.addf %109, %145 : vector<8x1xf32>
    %147 = arith.mulf %143, %143 : vector<8x384xf32>
    %cst_144 = arith.constant dense<0.000000e+00> : vector<8xf32>
    %148 = vector.multi_reduction <add>, %147, %cst_144 [1] : vector<8x384xf32> to vector<8xf32>
    %149 = vector.shape_cast %148 : vector<8xf32> to vector<8x1xf32>
    %150 = arith.addf %113, %149 : vector<8x1xf32>
    %cst_145 = arith.constant 9.765625E-4 : f32
    %151 = vector.broadcast %cst_145 : f32 to vector<8x1xf32>
    %152 = arith.mulf %146, %151 : vector<8x1xf32>
    %cst_146 = arith.constant 9.765625E-4 : f32
    %153 = vector.broadcast %cst_146 : f32 to vector<8x1xf32>
    %154 = arith.mulf %150, %153 : vector<8x1xf32>
    %155 = arith.mulf %152, %152 : vector<8x1xf32>
    %156 = arith.subf %154, %155 : vector<8x1xf32>
    %cst_147 = arith.constant 9.99999974E-6 : f32
    %157 = vector.broadcast %cst_147 : f32 to vector<8x1xf32>
    %158 = arith.addf %156, %157 : vector<8x1xf32>
    %159 = math.rsqrt %158 : vector<8x1xf32>
    %c0_148 = arith.constant 0 : index
    %c0_149 = arith.constant 0 : index
    %c0_150 = arith.constant 0 : index
    %160 = vector.load %arg6[%c0_148, %c0_149, %c0_150] : memref<4x8x384xf32, #tpu.memory_space<vmem>>, vector<1x8x384xf32>
    %161 = vector.shape_cast %160 : vector<1x8x384xf32> to vector<8x384xf32>
    %162 = vector.broadcast %152 : vector<8x1xf32> to vector<8x384xf32>
    %163 = arith.subf %161, %162 : vector<8x384xf32>
    %164 = vector.broadcast %159 : vector<8x1xf32> to vector<8x384xf32>
    %165 = arith.mulf %163, %164 : vector<8x384xf32>
    %cst_151 = arith.constant 0.000000e+00 : f32
    %166 = vector.broadcast %cst_151 : f32 to vector<8x384xf32>
    %167 = arith.maximumf %165, %166 : vector<8x384xf32>
    %168 = arith.truncf %167 : vector<8x384xf32> to vector<8x384xbf16>
    %c0_152 = arith.constant 0 : index
    %c0_153 = arith.constant 0 : index
    %c0_154 = arith.constant 0 : index
    %c0_155 = arith.constant 0 : index
    %169 = vector.load %arg5[%c0_152, %c0_153, %c0_154, %c0_155] : memref<1x4x8x384xbf16, #tpu.memory_space<vmem>>, vector<1x1x8x384xbf16>
    %170 = vector.shape_cast %169 : vector<1x1x8x384xbf16> to vector<8x384xbf16>
    %171 = vector.shape_cast %168 : vector<8x384xbf16> to vector<1x1x8x384xbf16>
    tpu.vector_store %arg5[%c0_152, %c0_153, %c0_154, %c0_155], %171 {strides = array<i32>} : memref<1x4x8x384xbf16, #tpu.memory_space<vmem>>, vector<1x1x8x384xbf16>,
    %c1_156 = arith.constant 1 : index
    %c0_157 = arith.constant 0 : index
    %c0_158 = arith.constant 0 : index
    %172 = vector.load %arg6[%c1_156, %c0_157, %c0_158] : memref<4x8x384xf32, #tpu.memory_space<vmem>>, vector<1x8x384xf32>
    %173 = vector.shape_cast %172 : vector<1x8x384xf32> to vector<8x384xf32>
    %174 = vector.broadcast %152 : vector<8x1xf32> to vector<8x384xf32>
    %175 = arith.subf %173, %174 : vector<8x384xf32>
    %176 = vector.broadcast %159 : vector<8x1xf32> to vector<8x384xf32>
    %177 = arith.mulf %175, %176 : vector<8x384xf32>
    %cst_159 = arith.constant 0.000000e+00 : f32
    %178 = vector.broadcast %cst_159 : f32 to vector<8x384xf32>
    %179 = arith.maximumf %177, %178 : vector<8x384xf32>
    %180 = arith.truncf %179 : vector<8x384xf32> to vector<8x384xbf16>
    %c0_160 = arith.constant 0 : index
    %c1_161 = arith.constant 1 : index
    %c0_162 = arith.constant 0 : index
    %c0_163 = arith.constant 0 : index
    %181 = vector.load %arg5[%c0_160, %c1_161, %c0_162, %c0_163] : memref<1x4x8x384xbf16, #tpu.memory_space<vmem>>, vector<1x1x8x384xbf16>
    %182 = vector.shape_cast %181 : vector<1x1x8x384xbf16> to vector<8x384xbf16>
    %183 = vector.shape_cast %180 : vector<8x384xbf16> to vector<1x1x8x384xbf16>
    tpu.vector_store %arg5[%c0_160, %c1_161, %c0_162, %c0_163], %183 {strides = array<i32>} : memref<1x4x8x384xbf16, #tpu.memory_space<vmem>>, vector<1x1x8x384xbf16>,
    %c2_164 = arith.constant 2 : index
    %c0_165 = arith.constant 0 : index
    %c0_166 = arith.constant 0 : index
    %184 = vector.load %arg6[%c2_164, %c0_165, %c0_166] : memref<4x8x384xf32, #tpu.memory_space<vmem>>, vector<1x8x384xf32>
    %185 = vector.shape_cast %184 : vector<1x8x384xf32> to vector<8x384xf32>
    %186 = vector.broadcast %152 : vector<8x1xf32> to vector<8x384xf32>
    %187 = arith.subf %185, %186 : vector<8x384xf32>
    %188 = vector.broadcast %159 : vector<8x1xf32> to vector<8x384xf32>
    %189 = arith.mulf %187, %188 : vector<8x384xf32>
    %cst_167 = arith.constant 0.000000e+00 : f32
    %190 = vector.broadcast %cst_167 : f32 to vector<8x384xf32>
    %191 = arith.maximumf %189, %190 : vector<8x384xf32>
    %192 = arith.truncf %191 : vector<8x384xf32> to vector<8x384xbf16>
    %c0_168 = arith.constant 0 : index
    %c2_169 = arith.constant 2 : index
    %c0_170 = arith.constant 0 : index
    %c0_171 = arith.constant 0 : index
    %193 = vector.load %arg5[%c0_168, %c2_169, %c0_170, %c0_171] : memref<1x4x8x384xbf16, #tpu.memory_space<vmem>>, vector<1x1x8x384xbf16>
    %194 = vector.shape_cast %193 : vector<1x1x8x384xbf16> to vector<8x384xbf16>
    %195 = vector.shape_cast %192 : vector<8x384xbf16> to vector<1x1x8x384xbf16>
    tpu.vector_store %arg5[%c0_168, %c2_169, %c0_170, %c0_171], %195 {strides = array<i32>} : memref<1x4x8x384xbf16, #tpu.memory_space<vmem>>, vector<1x1x8x384xbf16>,
    %c3_172 = arith.constant 3 : index
    %c0_173 = arith.constant 0 : index
    %c0_174 = arith.constant 0 : index
    %196 = vector.load %arg6[%c3_172, %c0_173, %c0_174] : memref<4x8x384xf32, #tpu.memory_space<vmem>>, vector<1x8x384xf32>
    %197 = vector.shape_cast %196 : vector<1x8x384xf32> to vector<8x384xf32>
    %198 = vector.broadcast %152 : vector<8x1xf32> to vector<8x384xf32>
    %199 = arith.subf %197, %198 : vector<8x384xf32>
    %200 = vector.broadcast %159 : vector<8x1xf32> to vector<8x384xf32>
    %201 = arith.mulf %199, %200 : vector<8x384xf32>
    %cst_175 = arith.constant 0.000000e+00 : f32
    %202 = vector.broadcast %cst_175 : f32 to vector<8x384xf32>
    %203 = arith.maximumf %201, %202 : vector<8x384xf32>
    %204 = arith.truncf %203 : vector<8x384xf32> to vector<8x384xbf16>
    %c0_176 = arith.constant 0 : index
    %c3_177 = arith.constant 3 : index
    %c0_178 = arith.constant 0 : index
    %c0_179 = arith.constant 0 : index
    %205 = vector.load %arg5[%c0_176, %c3_177, %c0_178, %c0_179] : memref<1x4x8x384xbf16, #tpu.memory_space<vmem>>, vector<1x1x8x384xbf16>
    %206 = vector.shape_cast %205 : vector<1x1x8x384xbf16> to vector<8x384xbf16>
    %207 = vector.shape_cast %204 : vector<8x384xbf16> to vector<1x1x8x384xbf16>
    tpu.vector_store %arg5[%c0_176, %c3_177, %c0_178, %c0_179], %207 {strides = array<i32>} : memref<1x4x8x384xbf16, #tpu.memory_space<vmem>>, vector<1x1x8x384xbf16>,
    return
  }
  func.func @transform_0(%arg0: i32, %arg1: i32) -> (i32, i32, i32) {
    %c0_i32 = arith.constant 0 : i32
    %c0_i32_0 = arith.constant 0 : i32
    %c0_i32_1 = arith.constant 0 : i32
    return %arg0, %c0_i32, %c0_i32_0 : i32, i32, i32
  }
  func.func @transform_1(%arg0: i32, %arg1: i32) -> (i32, i32, i32, i32) {
    %c0_i32 = arith.constant 0 : i32
    %c0_i32_0 = arith.constant 0 : i32
    %c0_i32_1 = arith.constant 0 : i32
    %c0_i32_2 = arith.constant 0 : i32
    return %c0_i32, %c0_i32_0, %arg1, %c0_i32_1 : i32, i32, i32, i32
  }
  func.func @transform_2(%arg0: i32, %arg1: i32) -> (i32, i32) {
    %c0_i32 = arith.constant 0 : i32
    %c0_i32_0 = arith.constant 0 : i32
    %c0_i32_1 = arith.constant 0 : i32
    return %c0_i32, %c0_i32_0 : i32, i32
  }
  func.func @transform_3(%arg0: i32, %arg1: i32) -> (i32, i32, i32, i32) {
    %c0_i32 = arith.constant 0 : i32
    %c0_i32_0 = arith.constant 0 : i32
    %c0_i32_1 = arith.constant 0 : i32
    return %arg0, %c0_i32, %arg1, %c0_i32_0 : i32, i32, i32, i32
  }
}

</mosaic_0001>

<bundles_post_ra>
// kernel: tpu_custom_call.1
= control target key start
LH: loop header
LB: loop body
LE: loop exit
PB: predicated region body
PF: predicated region fallthrough
CT: control target
= control target key end

     0   :  { %8 = vsyncpa [#allocation4], 0  ;;  %s2400_s0 = inlined_call_operand.vmem [shape: bf16[2,4,512], index: 0, kind: input, shape index: {}]   ;;  %s2401_s1 = inlined_call_operand.vmem [shape: bf16[4,4,8,4], index: 1, kind: input, shape index: {}]   ;;  %s2402_s2 = inlined_call_operand.vmem [shape: f32[1,384], index: 2, kind: input, shape index: {}]   ;;  %s2403_s3 = inlined_call_operand.hbm [shape: bf16[2,4,8,384], index: 3, kind: output, shape index: {}]  }
   0x1   :  { %10 = vsyncpa [#allocation4 + $0x1], 0  ;;  %s1944_s12 = smov 0   ;;  %s1946_s13 = smov 0  }
   0x2   :  { %s1948_s14 = smov 0   ;;  %s1950_s15 = smov 0  }
   0x3   :  { %s1952_s16 = smov 0   ;;  %s1954_s17 = smov 0  }
   0x4 LB: > { %s1684_s18 = sadd.s32 4294967295, %s1912_s17   ;;  %s1685_s19 = sadd.s32 4294967294, %s1912_s17   ;;  %s1912_s17 = sphi %s1954_s17, %s16_s17   ;;  %s1908_s16 = sphi %s1952_s16, %s2410_s16   ;;  %s1904_s15 = sphi %s1950_s15, %s2409_s15   ;;  %s1900_s14 = sphi %s1948_s14, %s2408_s14   ;;  %s1896_s13 = sphi %s1946_s13, %s2407_s13   ;;  %s1892_s12 = sphi %s1944_s12, %s2406_s12  }
   0x5   : > { %s28_s20 = sadd.s32 1, %s1908_s16  ;;  %s110_s21 = sadd.s32 1, %s1900_s14 }
   0x6   : > { %p30_p0 = scmp.ge.s32.totalorder %s28_s20, 2  ;;  %p120_p1 = scmp.ne.s32.totalorder %s1900_s14, %s1896_s13 }
   0x7   : > { %p121_p2 = scmp.eq.s32.totalorder %s1684_s18, 1  ;;  %p126_p3 = scmp.ne.s32.totalorder %s1896_s13, %s1892_s12 }
   0x8   : > { %s2412_s20 = smov (%p30_p0, %s28_s20), 0  ;;  %p127_p5 = scmp.eq.s32.totalorder %s1685_s19, 1 }
   0x9   : > { %p1984_p4 = por %p121_p2, %p120_p1  ;;  %s105_s23 = ssub.s32 %s1908_s16, %s2412_s20 }
   0xa   : > { %p1689_p6 = scmp.ge.s32.totalorder %s1912_s17, 1  ;;  %p108_p7 = scmp.eq.s32.totalorder %s105_s23, 0 }
   0xb   : > { %p1991_p8 = por %p127_p5, %p126_p3  ;;  %p163_p9 = scmp.lt.s32.totalorder %s1912_s17, 3 }
   0xc   : > { %s1997_s25 = scalar_select %p108_p7, %s1900_s14, %s110_s21  }
   0xd   : > { %p164_p10 = pnand %p1689_p6, %p163_p9 }
   0xe   : > { %p191_p11 = scmp.lt.s32.totalorder (!%p164_p10), %s1904_s15, 1  ;;  %s1914_s4 = smov (!%p164_p10), 127  }
   0xf   : > { %167 = sbr.rel (%p164_p10) target bundleno = 640 (0x280), region = 32  ;;  %s1915_s5 = smov (!%p164_p10), 110  }
  0x10   : > { %s1916_s6 = smov (!%p164_p10), 109   ;;  %s1917_s7 = smov (!%p164_p10), 126  }
  0x11   : > { %s1918_s8 = smov (!%p164_p10), 108   ;;  %s1919_s11 = smov (!%p164_p10), 92  }
  0x12   : > { %s1920_s18 = smov (!%p164_p10), 91   ;;  %s1921_s29 = smov (!%p164_p10), 90  }
  0x13   : > { %s1766_s21 = smul.u32 (!%p164_p10), 48, %s1904_s15 }
  0x14   : > { %s192_s26 = scalar_select %p191_p11, %s1904_s15, 1  ;;  %vm233_vm0 = vcmask 1041408   ;;  %v2056_v46 = vld [vmem:[%s2401_s1] sm:$0xf]  ;;  %vm229_vm1 = vcmask 31744   ;;  %vm356_vm2 = vcmask 900096  }
  0x15   : > { %vm225_vm3 = vcmask 1039360   ;;  %vm435_vm4 = vcmask 891904   ;;  %vm542_vm5 = vcmask 1031168   ;;  %vm767_vm6 = vcmask 883712   ;;  %s1592_s15 = scalar_lea.hbm %s2403_s3, %s1766_s21 }
  0x16   : > { %s1764_s27 = sshll.u32 %s192_s26, 3  ;;  %vm1014_vm7 = vcmask 752640   ;;  %vm1093_vm8 = vcmask 744448   ;;  %vm1418_vm9 = vcmask 736256  }
  0x17   : > { %s195_s30 = scalar_lea.vmem %s2400_s0, %s1764_s27 }
  0x18   : > { %v2004_v0 = vld [vmem:[%s195_s30] sm:$0xff] }
  0x19   : > { %208 = vst [vmem:[#allocation1] ss:$4 sm:$0xff] %v2004_v0  ;;  %v202_v1 = vld [vmem:[%s195_s30] sm:$0x3f] }
  0x20   : > { %v213_v2 = vld.sshfl [vmem:[#allocation1 + $0x10] sm:$0xff pattern:$0x73625140]  ;;  %v209_v3 = vld.sshfl [vmem:[#allocation1] sm:$0xff pattern:$0x73625140] }
  0x21   : > { %221 = vrot.lane.b32.xlu0 %v213_v2, %s1914_s4  ;;  %217 = vrot.lane.b32.xlu1 %v209_v3, %s1914_s4  ;;  %v215_v4 = vld.sshfl [vmem:[#allocation1 + $0x18] sm:$0xff pattern:$0x73625140]  ;;  %v211_v5 = vld.sshfl [vmem:[#allocation1 + $0x8] sm:$0xff pattern:$0x73625140] }
  0x22   : > { %283 = vst [vmem:[#allocation1] ss:$4 sm:$0xff] %v202_v1 }
  0x29   : > { %223 = vrot.lane.b32.xlu0 %v215_v4, %s1914_s4  ;;  %219 = vrot.lane.b32.xlu1 %v211_v5, %s1914_s4  ;;  %v2011_v6 = vld.sshfl [vmem:[#allocation1] sm:$0xff pattern:$0x73625140]  ;;  %v2013_v7 = vld.sshfl [vmem:[#allocation1 + $0x8] sm:$0xff pattern:$0x73625140] }
  0x2a   : > { %v2015_v8 = vld.sshfl [vmem:[#allocation1 + $0x10] sm:$0xff pattern:$0x73625140]  ;;  %v290_v45 = vsel %vm233_vm0, %v2011_v6, 0  ;;  %v292_v3 = vsel %vm233_vm0, %v2013_v7, 0 }
  0x2b   : > { %339 = vst [vmem:[#allocation1] ss:$4 sm:$0xff] %v2004_v0  ;;  %303 = vmatpush.bf16.msra.mxu3 %v290_v45 }
  0x2e   : > { %1696 = vmatmul.msk.bf16.vlgmr.msra.gmra.mxu3 %vm229_vm1, %v2056_v46 }
  0x32   : > { %v344_v9 = vld.sshfl [vmem:[#allocation1 + $0x10] sm:$0xff pattern:$0x73625140]  ;;  %v346_v10 = vld.sshfl [vmem:[#allocation1 + $0x18] sm:$0xff pattern:$0x73625140] }
  0x33   : > { %352 = vrot.lane.b32.xlu0 %v344_v9, %s1915_s5  ;;  %v342_v11 = vld.sshfl [vmem:[#allocation1 + $0x8] sm:$0xff pattern:$0x73625140]  ;;  %v340_v12 = vld.sshfl [vmem:[#allocation1] sm:$0xff pattern:$0x73625140] }
  0x34   : > { %348 = vrot.lane.b32.xlu2 %v340_v12, %s1915_s5  ;;  %418 = vst [vmem:[#allocation1] ss:$4 sm:$0xff] %v2004_v0  ;;  %v294_v9 = vsel %vm233_vm0, %v2015_v8, 0 }
  0x3b   : > { %v425_v13 = vld.sshfl [vmem:[#allocation1 + $0x18] sm:$0xff pattern:$0x73625140]  ;;  %v419_v14 = vld.sshfl [vmem:[#allocation1] sm:$0xff pattern:$0x73625140] }
  0x3c   : > { %433 = vrot.lane.b32.xlu0 %v425_v13, %s1916_s6  ;;  %v423_v15 = vld.sshfl [vmem:[#allocation1 + $0x10] sm:$0xff pattern:$0x73625140]  ;;  %v421_v16 = vld.sshfl [vmem:[#allocation1 + $0x8] sm:$0xff pattern:$0x73625140]  ;;  %350 = vrot.lane.b32.xlu2 %v342_v11, %s1915_s5 }
  0x3d   : > { %429 = vrot.lane.b32.xlu1 %v421_v16, %s1916_s6  ;;  %525 = vst [vmem:[#allocation1] ss:$4 sm:$0xff] %v2004_v0  ;;  %v1692_v13 = vld [vmem:[%s2401_s1 + $0x4] sm:$0xf] }
  0x44   : > { %v530_v17 = vld.sshfl [vmem:[#allocation1 + $0x10] sm:$0xff pattern:$0x73625140]  ;;  %v526_v18 = vld.sshfl [vmem:[#allocation1] sm:$0xff pattern:$0x73625140]  ;;  %431 = vrot.lane.b32.xlu2 %v423_v15, %s1916_s6 }
  0x45   : > { %354 = vrot.lane.b32.xlu1 %v346_v10, %s1915_s5  ;;  %538 = vrot.lane.b32.xlu0 %v530_v17, %s1917_s7  ;;  %v528_v19 = vld.sshfl [vmem:[#allocation1 + $0x8] sm:$0xff pattern:$0x73625140]  ;;  %v532_v20 = vld.sshfl [vmem:[#allocation1 + $0x18] sm:$0xff pattern:$0x73625140] }
  0x46   : > { %597 = vst [vmem:[#allocation1] ss:$4 sm:$0xff] %v2004_v0 }
  0x4c   : > { %427 = vrot.lane.b32.xlu2 %v419_v14, %s1916_s6 }
  0x4d   : > { %540 = vrot.lane.b32.xlu1 %v532_v20, %s1917_s7  ;;  %v600_v21 = vld.sshfl [vmem:[#allocation1 + $0x8] sm:$0xff pattern:$0x73625140]  ;;  %v602_v22 = vld.sshfl [vmem:[#allocation1 + $0x10] sm:$0xff pattern:$0x73625140] }
  0x4e   : > { %v604_v23 = vld.sshfl [vmem:[#allocation1 + $0x18] sm:$0xff pattern:$0x73625140]  ;;  %608 = vrot.lane.b32.xlu0 %v600_v21, %s1914_s4  ;;  %v598_v24 = vld.sshfl [vmem:[#allocation1] sm:$0xff pattern:$0x73625140] }
  0x4f   : > { %672 = vst [vmem:[#allocation1] ss:$4 sm:$0xff] %v2004_v0 }
  0x54   : > { %606 = vrot.lane.b32.xlu2 %v598_v24, %s1914_s4 }
  0x55   : > { %534 = vrot.lane.b32.xlu1 %v526_v18, %s1917_s7 }
  0x56   : > { %v673_v25 = vld.sshfl [vmem:[#allocation1] sm:$0xff pattern:$0x73625140]  ;;  %v677_v26 = vld.sshfl [vmem:[#allocation1 + $0x10] sm:$0xff pattern:$0x73625140] }
  0x57   : > { %v679_v27 = vld.sshfl [vmem:[#allocation1 + $0x18] sm:$0xff pattern:$0x73625140]  ;;  %681 = vrot.lane.b32.xlu0 %v673_v25, %s1916_s6  ;;  %v675_v28 = vld.sshfl [vmem:[#allocation1 + $0x8] sm:$0xff pattern:$0x73625140] }
  0x58   : > { %750 = vst [vmem:[#allocation1] ss:$4 sm:$0xff] %v2004_v0 }
  0x5c   : > { %536 = vrot.lane.b32.xlu2 %v528_v19, %s1917_s7 }
  0x5d   : > { %683 = vrot.lane.b32.xlu1 %v675_v28, %s1916_s6 }
  0x5f   : > { %610 = vrot.lane.b32.xlu0 %v602_v22, %s1914_s4  ;;  %v755_v29 = vld.sshfl [vmem:[#allocation1 + $0x10] sm:$0xff pattern:$0x73625140]  ;;  %v757_v30 = vld.sshfl [vmem:[#allocation1 + $0x18] sm:$0xff pattern:$0x73625140] }
  0x60   : > { %v751_v31 = vld.sshfl [vmem:[#allocation1] sm:$0xff pattern:$0x73625140]  ;;  %v753_v32 = vld.sshfl [vmem:[#allocation1 + $0x8] sm:$0xff pattern:$0x73625140] }
  0x61   : > { %851 = vst [vmem:[#allocation1] ss:$4 sm:$0xff] %v2004_v0 }
  0x64   : > { %685 = vrot.lane.b32.xlu2 %v677_v26, %s1916_s6 }
  0x65   : > { %612 = vrot.lane.b32.xlu1 %v604_v23, %s1914_s4 }
  0x67   : > { %763 = vrot.lane.b32.xlu0 %v755_v29, %s1918_s8 }
  0x68   : > { %v856_v33 = vld.sshfl [vmem:[#allocation1 + $0x10] sm:$0xff pattern:$0x73625140]  ;;  %v858_v34 = vld.sshfl [vmem:[#allocation1 + $0x18] sm:$0xff pattern:$0x73625140] }
  0x69   : > { %v852_v35 = vld.sshfl [vmem:[#allocation1] sm:$0xff pattern:$0x73625140]  ;;  %v854_v36 = vld.sshfl [vmem:[#allocation1 + $0x8] sm:$0xff pattern:$0x73625140] }
  0x6a   : > { %922 = vst [vmem:[#allocation1] ss:$4 sm:$0xff] %v2004_v0 }
  0x6c   : > { %761 = vrot.lane.b32.xlu2 %v753_v32, %s1918_s8 }
  0x6d   : > { %765 = vrot.lane.b32.xlu1 %v757_v30, %s1918_s8 }
  0x6f   : > { %759 = vrot.lane.b32.xlu0 %v751_v31, %s1918_s8 }
  0x71   : > { %v927_v37 = vld.sshfl [vmem:[#allocation1 + $0x10] sm:$0xff pattern:$0x73625140]  ;;  %v929_v38 = vld.sshfl [vmem:[#allocation1 + $0x18] sm:$0xff pattern:$0x73625140] }
  0x72   : > { %v923_v39 = vld.sshfl [vmem:[#allocation1] sm:$0xff pattern:$0x73625140]  ;;  %v925_v40 = vld.sshfl [vmem:[#allocation1 + $0x8] sm:$0xff pattern:$0x73625140] }
  0x73   : > { %997 = vst [vmem:[#allocation1] ss:$4 sm:$0xff] %v2004_v0 }
  0x74   : > { %687 = vrot.lane.b32.xlu2 %v679_v27, %s1916_s6 }
  0x75   : > { %864 = vrot.lane.b32.xlu1 %v856_v33, %s1916_s6 }
  0x77   : > { %931 = vrot.lane.b32.xlu0 %v923_v39, %s1915_s5 }
  0x7a   : > { %v1000_v41 = vld.sshfl [vmem:[#allocation1 + $0x8] sm:$0xff pattern:$0x73625140]  ;;  %v1004_v42 = vld.sshfl [vmem:[#allocation1 + $0x18] sm:$0xff pattern:$0x73625140] }
  0x7b   : > { %v1002_v43 = vld.sshfl [vmem:[#allocation1 + $0x10] sm:$0xff pattern:$0x73625140]  ;;  %v998_v44 = vld.sshfl [vmem:[#allocation1] sm:$0xff pattern:$0x73625140] }
  0x7c   : > { %1076 = vst [vmem:[#allocation1] ss:$4 sm:$0xff] %v2004_v0  ;;  %866 = vrot.lane.b32.xlu2 %v858_v34, %s1916_s6 }
  0x7d   : > { %933 = vrot.lane.b32.xlu1 %v925_v40, %s1915_s5 }
  0x7f   : > { %862 = vrot.lane.b32.xlu0 %v854_v36, %s1916_s6  ;;  %v1703_v36 = vld [vmem:[%s2401_s1 + $0xc] sm:$0xf] }
  0x83   : > { %v1083_v47 = vld.sshfl [vmem:[#allocation1 + $0x18] sm:$0xff pattern:$0x73625140]  ;;  %v1079_v48 = vld.sshfl [vmem:[#allocation1 + $0x8] sm:$0xff pattern:$0x73625140] }
  0x84   : > { %860 = vrot.lane.b32.xlu2 %v852_v35, %s1916_s6  ;;  %v1081_v49 = vld.sshfl [vmem:[#allocation1 + $0x10] sm:$0xff pattern:$0x73625140]  ;;  %v1077_v50 = vld.sshfl [vmem:[#allocation1] sm:$0xff pattern:$0x73625140] }
  0x85   : > { %1006 = vrot.lane.b32.xlu1 %v998_v44, %s1919_s11  ;;  %1177 = vst [vmem:[#allocation1] ss:$4 sm:$0xff] %v2004_v0 }
  0x87   : > { %1010 = vrot.lane.b32.xlu0 %v1002_v43, %s1919_s11 }
  0x8c   : > { %1008 = vrot.lane.b32.xlu2 %v1000_v41, %s1919_s11  ;;  %v1178_v51 = vld.sshfl [vmem:[#allocation1] sm:$0xff pattern:$0x73625140]  ;;  %v2063_v52 = vld.sshfl [vmem:[#allocation1 + $0x8] sm:$0xff pattern:$0x73625140] }
  0x8d   : > { %935 = vrot.lane.b32.xlu1 %v927_v37, %s1915_s5  ;;  %v1182_v53 = vld.sshfl [vmem:[#allocation1 + $0x10] sm:$0xff pattern:$0x73625140]  ;;  %v1184_v54 = vld.sshfl [vmem:[#allocation1 + $0x18] sm:$0xff pattern:$0x73625140] }
  0x8e   : > { %v349_v55 = vpop.permute.xlu2 %348  ;;  %1248 = vst [vmem:[#allocation1] ss:$4 sm:$0xff] %v2004_v0 }
  0x8f   : > { %1087 = vrot.lane.b32.xlu0 %v1079_v48, %s1920_s18 }
  0x93   : > { %v222_v56 = vpop.permute.xlu0 %221  ;;  %v218_v57 = vpop.permute.xlu1 %217 }
  0x94   : > { %937 = vrot.lane.b32.xlu2 %v929_v38, %s1915_s5 }
  0x95   : > { %1089 = vrot.lane.b32.xlu1 %v1081_v49, %s1920_s18  ;;  %v1251_v58 = vld.sshfl [vmem:[#allocation1 + $0x8] sm:$0xff pattern:$0x73625140]  ;;  %v2070_v59 = vld.sshfl [vmem:[#allocation1 + $0x10] sm:$0xff pattern:$0x73625140] }
  0x96   : > { %v351_v60 = vpop.permute.xlu2 %350  ;;  %v2072_v61 = vld.sshfl [vmem:[#allocation1 + $0x18] sm:$0xff pattern:$0x73625140]  ;;  %v1249_v62 = vld.sshfl [vmem:[#allocation1] sm:$0xff pattern:$0x73625140] }
  0x97   : > { %1012 = vrot.lane.b32.xlu0 %v1004_v42, %s1919_s11  ;;  %1323 = vst [vmem:[#allocation1] ss:$4 sm:$0xff] %v2004_v0  ;;  %v357_v63 = vsel %vm356_vm2, %v349_v55, %v351_v60 }
  0x98   : > { %v364_v7 = vsel %vm233_vm0, %v357_v63, 0 }
  0x9b   : > { %v224_v1 = vpop.permute.xlu0 %223  ;;  %v220_v2 = vpop.permute.xlu1 %219 }
  0x9c   : > { %v226_v4 = vsel %vm225_vm3, %v218_v57, %v220_v2  ;;  %v227_v5 = vsel %vm225_vm3, %v220_v2, %v222_v56  ;;  %v228_v6 = vsel %vm225_vm3, %v222_v56, %v224_v1  ;;  %1091 = vrot.lane.b32.xlu2 %v1083_v47, %s1920_s18  ;;  %v1708_v56 = vld [vmem:[%s2401_s1 + $0x14] sm:$0xf] }
  0x9d   : > { %1085 = vrot.lane.b32.xlu1 %v1077_v50, %s1920_s18  ;;  %v235_v10 = vsel %vm233_vm0, %v226_v4, 0  ;;  %v238_v11 = vsel %vm233_vm0, %v227_v5, 0  ;;  %v241_v12 = vsel %vm233_vm0, %v228_v6, 0 }
  0x9e   : > { %250 = vmatpush.bf16.msra.mxu0 %v235_v10  ;;  %263 = vmatpush.bf16.msra.mxu1 %v238_v11  ;;  %v1324_v14 = vld.sshfl [vmem:[#allocation1] sm:$0xff pattern:$0x73625140]  ;;  %v1326_v15 = vld.sshfl [vmem:[#allocation1 + $0x8] sm:$0xff pattern:$0x73625140]  ;;  %v432_v16 = vpop.permute.xlu2 %431 }
  0x9f   : > { %276 = vmatpush.bf16.msra.mxu2 %v241_v12  ;;  %v2092_v8 = vld.sshfl [vmem:[#allocation1 + $0x18] sm:$0xff pattern:$0x73625140]  ;;  %1192 = vrot.lane.b32.xlu0 %v1184_v54, %s1918_s8  ;;  %v1328_v17 = vld.sshfl [vmem:[#allocation1 + $0x10] sm:$0xff pattern:$0x73625140] }
  0xa0   : > { %1401 = vst [vmem:[#allocation1] ss:$4 sm:$0xff] %v2004_v0  ;;  %v1699_v0 = vld [vmem:[%s2401_s1 + $0x8] sm:$0xf]  ;;  %v1715_v10 = vld [vmem:[%s2401_s1 + $0x18] sm:$0xf] }
  0xa1   : > { %1693 = vmatmul.msk.bf16.vlgmr.msra.gmra.mxu0 %vm229_vm1, %v1692_v13  ;;  %1694 = vmatmul.msk.bf16.vlgmr.msra.gmra.mxu1 %vm229_vm1, %v1692_v13 }
  0xa2   : > { %316 = vmatpush.bf16.msrb.mxu0 %v292_v3  ;;  %1695 = vmatmul.msk.bf16.vlgmr.msra.gmra.mxu2 %vm229_vm1, %v1692_v13 }
  0xa3   : > { %379 = vmatpush.bf16.msrb.mxu2 %v364_v7  ;;  %329 = vmatpush.bf16.msrb.mxu1 %v294_v9 }
  0xa4   : > { %1190 = vrot.lane.b32.xlu2 %v1182_v53, %s1918_s8 }
  0xa5   : > { %1257 = vrot.lane.b32.xlu1 %v1249_v62, %s1916_s6  ;;  %v353_v18 = vpop.permute.xlu0 %352 }
  0xa6   : > { %v358_v19 = vsel %vm356_vm2, %v351_v60, %v353_v18  ;;  %v428_v20 = vpop.permute.xlu2 %427 }
  0xa7   : > { %v367_v21 = vsel %vm233_vm0, %v358_v19, 0  ;;  %1186 = vrot.lane.b32.xlu0 %v1178_v51, %s1918_s8  ;;  %v1404_v39 = vld.sshfl [vmem:[#allocation1 + $0x8] sm:$0xff pattern:$0x73625140] }
  0xa8   : > { %392 = vmatpush.bf16.msrb.mxu3 %v367_v21  ;;  %v1408_v40 = vld.sshfl [vmem:[#allocation1 + $0x18] sm:$0xff pattern:$0x73625140]  ;;  %v1406_v48 = vld.sshfl [vmem:[#allocation1 + $0x10] sm:$0xff pattern:$0x73625140] }
  0xa9   : > { %v1402_v55 = vld.sshfl [vmem:[#allocation1] sm:$0xff pattern:$0x73625140] }
  0xab   : > { %1701 = vmatmul.msk.bf16.vlgmr.msrb.gmra.mxu3 %vm229_vm1, %v1699_v0 }
  0xac   : > { %1259 = vrot.lane.b32.xlu2 %v1251_v58, %s1916_s6 }
  0xad   : > { %1188 = vrot.lane.b32.xlu1 %v2063_v52, %s1918_s8  ;;  %v1707_v52 = vld [vmem:[%s2401_s1 + $0x10] sm:$0xf]  ;;  %s1854_s8 = scalar_lea.hbm %s2403_s3, 96 }
  0xae   : > { %v434_v22 = vpop.permute.xlu0 %433  ;;  %v607_v23 = vpop.permute.xlu2 %606 }
  0xaf   : > { %v438_v24 = vsel %vm435_vm4, %v432_v16, %v434_v22  ;;  %v430_v25 = vpop.permute.xlu1 %429  ;;  %1334 = vrot.lane.b32.xlu0 %v1326_v15, %s1920_s18  ;;  %v1719_v22 = vld [vmem:[%s2401_s1 + $0x1c] sm:$0xf] }
  0xb0   : > { %v449_v26 = vsel %vm233_vm0, %v438_v24, 0  ;;  %v437_v27 = vsel %vm435_vm4, %v430_v25, %v432_v16  ;;  %v436_v28 = vsel %vm435_vm4, %v428_v20, %v430_v25 }
  0xb1   : > { %v446_v29 = vsel %vm233_vm0, %v437_v27, 0  ;;  %v443_v30 = vsel %vm233_vm0, %v436_v28, 0  ;;  %1697 = vmatmul.msk.bf16.vlgmr.msrb.gmra.mxu0 %vm229_vm1, %v2056_v46  ;;  %1698 = vmatmul.msk.bf16.vlgmr.msrb.gmra.mxu1 %vm229_vm1, %v2056_v46 }
  0xb2   : > { %1700 = vmatmul.msk.bf16.vlgmr.msrb.gmra.mxu2 %vm229_vm1, %v1699_v0  ;;  %458 = vmatpush.bf16.msra.mxu1 %v443_v30 }
  0xb3   : > { %471 = vmatpush.bf16.msra.mxu2 %v446_v29  ;;  %484 = vmatpush.bf16.msra.mxu3 %v449_v26 }
  0xb4   : > { %1332 = vrot.lane.b32.xlu2 %v1324_v14, %s1920_s18 }
  0xb5   : > { %1336 = vrot.lane.b32.xlu1 %v1328_v17, %s1920_s18 }
  0xb6   : > { %v537_v31 = vpop.permute.xlu2 %536 }
  0xb7   : > { %v355_v32 = vpop.permute.xlu1 %354  ;;  %v539_v33 = vpop.permute.xlu0 %538  ;;  %1263 = vrot.lane.b32.xlu0 %v2072_v61, %s1916_s6 }
  0xb8   : > { %v359_v34 = vsel %vm356_vm2, %v353_v18, %v355_v32  ;;  %v544_v35 = vsel %vm542_vm5, %v537_v31, %v539_v33 }
  0xb9   : > { %v370_v37 = vsel %vm233_vm0, %v359_v34, 0  ;;  %v553_v38 = vsel %vm233_vm0, %v544_v35, 0 }
  0xba   : > { %405 = vmatpush.bf16.msra.mxu0 %v370_v37  ;;  %578 = vmatpush.bf16.msrb.mxu1 %v553_v38  ;;  %v1723_v37 = vld [vmem:[%s2401_s1 + $0x20] sm:$0xf] }
  0xbb   : > { %1706 = vmatmul.msk.bf16.vlgmr.msra.gmra.mxu3 %vm229_vm1, %v1703_v36 }
  0xbc   : > { %1261 = vrot.lane.b32.xlu2 %v2070_v59, %s1916_s6 }
  0xbd   : > { %1412 = vrot.lane.b32.xlu1 %v1404_v39, %s1921_s29 }
  0xbe   : > { %v686_v41 = vpop.permute.xlu2 %685 }
  0xbf   : > { %v541_v42 = vpop.permute.xlu1 %540  ;;  %1416 = vrot.lane.b32.xlu0 %v1408_v40, %s1921_s29 }
  0xc0   : > { %v545_v43 = vsel %vm542_vm5, %v539_v33, %v541_v42  ;;  %v609_v44 = vpop.permute.xlu0 %608  ;;  %v1724_v42 = vld [vmem:[%s2401_s1 + $0x24] sm:$0xf] }
  0xc1   : > { %v556_v45 = vsel %vm233_vm0, %v545_v43, 0  ;;  %v614_v46 = vsel %vm225_vm3, %v607_v23, %v609_v44  ;;  %1702 = vmatmul.msk.bf16.vlgmr.msra.gmra.mxu0 %vm229_vm1, %v1699_v0  ;;  %1704 = vmatmul.msk.bf16.vlgmr.msra.gmra.mxu1 %vm229_vm1, %v1703_v36 }
  0xc2   : > { %v621_v47 = vsel %vm233_vm0, %v614_v46, 0  ;;  %591 = vmatpush.bf16.msrb.mxu2 %v556_v45 }
  0xc3   : > { %1705 = vmatmul.msk.bf16.vlgmr.msra.gmra.mxu2 %vm229_vm1, %v1703_v36  ;;  %636 = vmatpush.bf16.msrb.mxu3 %v621_v47 }
  0xc4   : > { %1414 = vrot.lane.b32.xlu2 %v1406_v48, %s1921_s29 }
  0xc5   : > { %1338 = vrot.lane.b32.xlu1 %v2092_v8, %s1920_s18  ;;  %s188_s18 = sand.u32 1, %s1896_s13  }
  0xc6   : > { %v762_v49 = vpop.permute.xlu2 %761  ;;  %s1765_s19 = smul.u32 48, %s188_s18  ;;  %s1579_s30 = scalar_lea.sflag [#allocation4], %s188_s18 }
  0xc7   : > { %v535_v50 = vpop.permute.xlu1 %534 }
  0xc8   : > { %v543_v51 = vsel %vm542_vm5, %v535_v50, %v537_v31  ;;  %v2214_v50 = vpop.f32.mrf.mxu3  ;;  %s190_s27 = scalar_lea.vmem [#allocation3], %s1765_s19 }
  0xc9   : > { %v550_v53 = vsel %vm233_vm0, %v543_v51, 0  ;;  %v682_v54 = vpop.permute.xlu0 %681  ;;  %s1593_s28 = sshll.u32 %s190_s27, 4  ;;  %s1594_s28 = int_to_ptr.vmem [resolvable:$true] %s1593_s28 }
  0xca   : > { %565 = vmatpush.bf16.msrb.mxu0 %v550_v53 }
  0xcb   : > { %1712 = vmatmul.msk.bf16.vlgmr.msrb.gmra.mxu3 %vm229_vm1, %v1707_v52 }
  0xcc   : > { %1410 = vrot.lane.b32.xlu2 %v1402_v55, %s1921_s29  ;;  %v1731_v55 = vld [vmem:[%s2401_s1 + $0x28] sm:$0xf]  ;;  %s1595_s29 = sshll.u32 %s1592_s15, 4  ;;  %s1596_s29 = int_to_ptr.hbm [resolvable:$true] %s1595_s29 }
  0xcd   : > { %s1848_s4 = sshra.s32 %s1596_s29, 4  ;;  %s1849_s4 = int_to_ptr.hbm [resolvable:$true] %s1848_s4 }
  0xce   : > { %v688_v57 = vpop.permute.xlu2 %687  ;;  %s1850_s5 = scalar_lea.hbm %s1849_s4, 48  ;;  %p1855_p1 = scmp.lt.s32.totalorder %s1849_s4, %s2403_s3 }
  0xcf   : > { %v684_v58 = vpop.permute.xlu1 %683  ;;  %v691_v59 = vsel %vm435_vm4, %v686_v41, %v688_v57  ;;  %p1851_p12 = scmp.ne.s32.totalorder %s1849_s4, %s1850_s5  ;;  %p1856_p2 = scmp.lt.s32.totalorder %s1854_s8, %s1850_s5 }
  0xd0   : > { %v689_v60 = vsel %vm435_vm4, %v682_v54, %v684_v58  ;;  %v690_v61 = vsel %vm435_vm4, %v684_v58, %v686_v41  ;;  %v702_v3 = vsel %vm233_vm0, %v691_v59, 0 }
  0xd1   : > { %v696_v62 = vsel %vm233_vm0, %v689_v60, 0  ;;  %v699_v63 = vsel %vm233_vm0, %v690_v61, 0  ;;  %v611_v1 = vpop.permute.xlu0 %610  ;;  %1709 = vmatmul.msk.bf16.vlgmr.msrb.gmra.mxu0 %vm229_vm1, %v1708_v56  ;;  %1710 = vmatmul.msk.bf16.vlgmr.msrb.gmra.mxu1 %vm229_vm1, %v1708_v56  ;;  %v307_v61 = vpop.f32.mrf.mxu3  ;;  %p1852_p13 = pnand %p1851_p12, %p1984_p4  ;;  %p1857_p3 = por %p1856_p2, %p1855_p1 }
  0xd2   : > { %v615_v2 = vsel %vm225_vm3, %v609_v44, %v611_v1  ;;  %711 = vmatpush.bf16.msra.mxu2 %v696_v62  ;;  %724 = vmatpush.bf16.msra.mxu3 %v699_v63 }
  0xd3   : > { %v624_v4 = vsel %vm233_vm0, %v615_v2, 0  ;;  %1711 = vmatmul.msk.bf16.vlgmr.msrb.gmra.mxu2 %vm229_vm1, %v1708_v56  ;;  %p1853_p0 = pneg %p1852_p13 }
  0xd4   : > { %649 = vmatpush.bf16.msra.mxu0 %v624_v4 }
  0xd5   : > { %p1858_p5 = pnand %p1857_p3, %p1853_p0 }
  0xd6   : > { %v867_v5 = vpop.permute.xlu2 %866 }
  0xd7   : > { %v613_v6 = vpop.permute.xlu1 %612 }
  0xd8   : > { %737 = vmatpush.bf16.msrb.mxu0 %v702_v3  ;;  %v616_v9 = vsel %vm225_vm3, %v611_v1, %v613_v6 }
  0xd9   : > { %v627_v11 = vsel %vm233_vm0, %v616_v9, 0  ;;  %v764_v12 = vpop.permute.xlu0 %763 }
  0xda   : > { %v769_v7 = vsel %vm767_vm6, %v762_v49, %v764_v12  ;;  %662 = vmatpush.bf16.msra.mxu1 %v627_v11 }
  0xdb   : > { %v778_v13 = vsel %vm233_vm0, %v769_v7, 0  ;;  %1717 = vmatmul.msk.bf16.vlgmr.msra.gmra.mxu3 %vm229_vm1, %v1715_v10 }
  0xdc   : > { %803 = vmatpush.bf16.msrb.mxu2 %v778_v13 }
  0xde   : > { %v861_v14 = vpop.permute.xlu2 %860 }
  0xdf   : > { %v766_v15 = vpop.permute.xlu1 %765 }
  0xe0   : > { %v770_v16 = vsel %vm767_vm6, %v764_v12, %v766_v15 }
  0xe1   : > { %v781_v8 = vsel %vm233_vm0, %v770_v16, 0  ;;  %v760_v17 = vpop.permute.xlu0 %759  ;;  %1713 = vmatmul.msk.bf16.vlgmr.msra.gmra.mxu0 %vm229_vm1, %v1707_v52  ;;  %1714 = vmatmul.msk.bf16.vlgmr.msra.gmra.mxu1 %vm229_vm1, %v1707_v52 }
  0xe2   : > { %v768_v18 = vsel %vm767_vm6, %v760_v17, %v762_v49  ;;  %816 = vmatpush.bf16.msrb.mxu3 %v781_v8 }
  0xe3   : > { %v775_v19 = vsel %vm233_vm0, %v768_v18, 0  ;;  %1716 = vmatmul.msk.bf16.vlgmr.msra.gmra.mxu2 %vm229_vm1, %v1715_v10 }
  0xe4   : > { %790 = vmatpush.bf16.msrb.mxu1 %v775_v19 }
  0xe6   : > { %v1009_v20 = vpop.permute.xlu2 %1008 }
  0xe7   : > { %v865_v21 = vpop.permute.xlu1 %864 }
  0xe8   : > { %v870_v0 = vsel %vm435_vm4, %v865_v21, %v867_v5 }
  0xe9   : > { %v881_v23 = vsel %vm233_vm0, %v870_v0, 0  ;;  %v932_v24 = vpop.permute.xlu0 %931 }
  0xea   : > { %916 = vmatpush.bf16.msra.mxu2 %v881_v23 }
  0xeb   : > { %1722 = vmatmul.msk.bf16.vlgmr.msrb.gmra.mxu3 %vm229_vm1, %v1719_v22 }
  0xee   : > { %v938_v25 = vpop.permute.xlu2 %937 }
  0xef   : > { %v934_v26 = vpop.permute.xlu1 %933 }
  0xf0   : > { %v939_v27 = vsel %vm356_vm2, %v932_v24, %v934_v26 }
  0xf1   : > { %v946_v28 = vsel %vm233_vm0, %v939_v27, 0  ;;  %v863_v29 = vpop.permute.xlu0 %862  ;;  %1718 = vmatmul.msk.bf16.vlgmr.msrb.gmra.mxu0 %vm229_vm1, %v1715_v10  ;;  %1720 = vmatmul.msk.bf16.vlgmr.msrb.gmra.mxu1 %vm229_vm1, %v1719_v22  ;;  %v1735_v10 = vld [vmem:[%s2401_s1 + $0x2c] sm:$0xf] }
  0xf2   : > { %v868_v30 = vsel %vm435_vm4, %v861_v14, %v863_v29  ;;  %v869_v31 = vsel %vm435_vm4, %v863_v29, %v865_v21  ;;  %961 = vmatpush.bf16.msra.mxu3 %v946_v28  ;;  %v1739_v28 = vld [vmem:[%s2401_s1 + $0x30] sm:$0xf] }
  0xf3   : > { %v875_v32 = vsel %vm233_vm0, %v868_v30, 0  ;;  %v878_v33 = vsel %vm233_vm0, %v869_v31, 0  ;;  %1721 = vmatmul.msk.bf16.vlgmr.msrb.gmra.mxu2 %vm229_vm1, %v1719_v22 }
  0xf4   : > { %903 = vmatpush.bf16.msra.mxu1 %v878_v33  ;;  %890 = vmatpush.bf16.msra.mxu0 %v875_v32 }
  0xf6   : > { %v1092_v34 = vpop.permute.xlu2 %1091 }
  0xf7   : > { %v1007_v35 = vpop.permute.xlu1 %1006 }
  0xf8   : > { %v1015_v36 = vsel %vm1014_vm7, %v1007_v35, %v1009_v20 }
  0xf9   : > { %v1011_v38 = vpop.permute.xlu0 %1010  ;;  %v1022_v39 = vsel %vm233_vm0, %v1015_v36, 0 }
  0xfa   : > { %v1016_v40 = vsel %vm1014_vm7, %v1009_v20, %v1011_v38  ;;  %1037 = vmatpush.bf16.msrb.mxu2 %v1022_v39 }
  0xfb   : > { %v1025_v41 = vsel %vm233_vm0, %v1016_v40, 0  ;;  %1728 = vmatmul.msk.bf16.vlgmr.msra.gmra.mxu3 %vm229_vm1, %v1723_v37 }
  0xfc   : > { %1050 = vmatpush.bf16.msrb.mxu3 %v1025_v41 }
  0xfe   : > { %v1191_v43 = vpop.permute.xlu2 %1190 }
  0xff   : > { %v936_v44 = vpop.permute.xlu1 %935 }
 0x100   : > { %v940_v45 = vsel %vm356_vm2, %v934_v26, %v936_v44  ;;  %v941_v46 = vsel %vm356_vm2, %v936_v44, %v938_v25 }
 0x101   : > { %v949_v47 = vsel %vm233_vm0, %v940_v45, 0  ;;  %v952_v48 = vsel %vm233_vm0, %v941_v46, 0  ;;  %v1088_v49 = vpop.permute.xlu0 %1087  ;;  %1725 = vmatmul.msk.bf16.vlgmr.msra.gmra.mxu0 %vm229_vm1, %v1724_v42  ;;  %1726 = vmatmul.msk.bf16.vlgmr.msra.gmra.mxu1 %vm229_vm1, %v1724_v42 }
 0x102   : > { %974 = vmatpush.bf16.msrb.mxu0 %v949_v47  ;;  %987 = vmatpush.bf16.msrb.mxu1 %v952_v48 }
 0x103   : > { %1727 = vmatmul.msk.bf16.vlgmr.msra.gmra.mxu2 %vm229_vm1, %v1724_v42 }
 0x106   : > { %v1260_v51 = vpop.permute.xlu2 %1259 }
 0x107   : > { %v1090_v52 = vpop.permute.xlu1 %1089 }
 0x108   : > { %v1095_v53 = vsel %vm1093_vm8, %v1088_v49, %v1090_v52  ;;  %v1096_v54 = vsel %vm1093_vm8, %v1090_v52, %v1092_v34 }
 0x109   : > { %v1104_v56 = vsel %vm233_vm0, %v1095_v53, 0  ;;  %v1107_v57 = vsel %vm233_vm0, %v1096_v54, 0  ;;  %v1013_v58 = vpop.permute.xlu0 %1012 }
 0x10a   : > { %v1017_v59 = vsel %vm1014_vm7, %v1011_v38, %v1013_v58  ;;  %1129 = vmatpush.bf16.msra.mxu2 %v1104_v56  ;;  %1142 = vmatpush.bf16.msra.mxu3 %v1107_v57  ;;  %v1740_v38 = vld [vmem:[%s2401_s1 + $0x34] sm:$0xf] }
 0x10b   : > { %v1028_v60 = vsel %vm233_vm0, %v1017_v59, 0  ;;  %1733 = vmatmul.msk.bf16.vlgmr.msrb.gmra.mxu3 %vm229_vm1, %v1731_v55 }
 0x10c   : > { %1063 = vmatpush.bf16.msra.mxu0 %v1028_v60 }
 0x10e   : > { %v1333_v1 = vpop.permute.xlu2 %1332 }
 0x10f   : > { %v1086_v62 = vpop.permute.xlu1 %1085 }
 0x110   : > { %v1094_v63 = vsel %vm1093_vm8, %v1086_v62, %v1088_v49 }
 0x111   : > { %v1101_v2 = vsel %vm233_vm0, %v1094_v63, 0  ;;  %1729 = vmatmul.msk.bf16.vlgmr.msrb.gmra.mxu0 %vm229_vm1, %v1723_v37  ;;  %1730 = vmatmul.msk.bf16.vlgmr.msrb.gmra.mxu1 %vm229_vm1, %v1723_v37  ;;  %v1193_v3 = vpop.permute.xlu0 %1192  ;;  %v201_v63 = vld [vmem:[%s2402_s2] sm:$0x7] }
 0x112   : > { %1116 = vmatpush.bf16.msra.mxu1 %v1101_v2  ;;  %v1196_v4 = vsel %vm767_vm6, %v1191_v43, %v1193_v3 }
 0x113   : > { %1732 = vmatmul.msk.bf16.vlgmr.msrb.gmra.mxu2 %vm229_vm1, %v1731_v55  ;;  %v1207_v5 = vsel %vm233_vm0, %v1196_v4, 0 }
 0x114   : > { %1242 = vmatpush.bf16.msrb.mxu2 %v1207_v5  ;;  %v2287_v5 = vperm.slane %v201_v63, 0 }
 0x116   : > { %v1262_v7 = vpop.permute.xlu2 %1261 }
 0x117   : > { %v1258_v6 = vpop.permute.xlu1 %1257  ;;  %v1266_v13 = vsel %vm435_vm4, %v1260_v51, %v1262_v7 }
 0x118   : > { %v1265_v9 = vsel %vm435_vm4, %v1258_v6, %v1260_v51  ;;  %v1275_v18 = vsel %vm233_vm0, %v1266_v13, 0 }
 0x119   : > { %v1272_v11 = vsel %vm233_vm0, %v1265_v9, 0  ;;  %v1187_v12 = vpop.permute.xlu0 %1186  ;;  %v2292_v9 = vperm.slane %v201_v63, 2 }
 0x11a   : > { %1287 = vmatpush.bf16.msrb.mxu3 %v1272_v11 }
 0x11b   : > { %1738 = vmatmul.msk.bf16.vlgmr.msra.gmra.mxu3 %vm229_vm1, %v1735_v10 }
 0x11e   : > { %v2240_v14 = vpop.f32.mrf.mxu0  ;;  %v2242_v15 = vpop.f32.mrf.mxu1 }
 0x11f   : > { %v1189_v16 = vpop.permute.xlu1 %1188  ;;  %v1415_v23 = vpop.permute.xlu2 %1414  ;;  %v306_v60 = vadd.f32 %v2214_v50, %v2240_v14 }
 0x120   : > { %v1195_v8 = vsel %vm767_vm6, %v1189_v16, %v1191_v43  ;;  %v1194_v17 = vsel %vm767_vm6, %v1187_v12, %v1189_v16  ;;  %v1751_v16 = vld [vmem:[%s2401_s1 + $0x3c] sm:$0xf] }
 0x121   : > { %v1204_v19 = vsel %vm233_vm0, %v1195_v8, 0  ;;  %1734 = vmatmul.msk.bf16.vlgmr.msra.gmra.mxu0 %vm229_vm1, %v1731_v55  ;;  %1736 = vmatmul.msk.bf16.vlgmr.msra.gmra.mxu1 %vm229_vm1, %v1735_v10  ;;  %v1201_v20 = vsel %vm233_vm0, %v1194_v17, 0  ;;  %v1335_v21 = vpop.permute.xlu0 %1334  ;;  %v1747_v55 = vld [vmem:[%s2401_s1 + $0x38] sm:$0xf] }
 0x122   : > { %1229 = vmatpush.bf16.msrb.mxu1 %v1204_v19  ;;  %1216 = vmatpush.bf16.msrb.mxu0 %v1201_v20  ;;  %v1340_v0 = vsel %vm1093_vm8, %v1333_v1, %v1335_v21 }
 0x123   : > { %1737 = vmatmul.msk.bf16.vlgmr.msra.gmra.mxu2 %vm229_vm1, %v1735_v10  ;;  %v1347_v22 = vsel %vm233_vm0, %v1340_v0, 0  ;;  %v2294_v10 = vperm.slane %v201_v63, 1 }
 0x124   : > { %1362 = vmatpush.bf16.msra.mxu2 %v1347_v22 }
 0x125   : > { %v278_v24 = vpop.f32.mrf.mxu2 }
 0x126   : > { %1300 = vmatpush.bf16.msra.mxu0 %v1275_v18  ;;  %v254_v25 = vpop.f32.mrf.mxu0  ;;  %v267_v26 = vpop.f32.mrf.mxu1 }
 0x127   : > { %v1337_v27 = vpop.permute.xlu1 %1336  ;;  %v1411_v35 = vpop.permute.xlu2 %1410 }
 0x128   : > { %v1341_v29 = vsel %vm1093_vm8, %v1335_v21, %v1337_v27 }
 0x129   : > { %v1350_v30 = vsel %vm233_vm0, %v1341_v29, 0  ;;  %v1264_v31 = vpop.permute.xlu0 %1263 }
 0x12a   : > { %1375 = vmatpush.bf16.msra.mxu3 %v1350_v30  ;;  %v1267_v32 = vsel %vm435_vm4, %v1262_v7, %v1264_v31 }
 0x12b   : > { %1744 = vmatmul.msk.bf16.vlgmr.msrb.gmra.mxu3 %vm229_vm1, %v1739_v28  ;;  %v1278_v33 = vsel %vm233_vm0, %v1267_v32, 0 }
 0x12c   : > { %1313 = vmatpush.bf16.msra.mxu1 %v1278_v33 }
 0x12d   : > { %v280_v34 = vpop.f32.mrf.mxu2 }
 0x12e   : > { %v318_v36 = vpop.f32.mrf.mxu0  ;;  %v331_v37 = vpop.f32.mrf.mxu1 }
 0x12f   : > { %v1413_v39 = vpop.permute.xlu1 %1412  ;;  %v394_v40 = vpop.f32.mrf.mxu3  ;;  %v332_v61 = vadd.f32 %v331_v37, %v278_v24  ;;  %v319_v1 = vadd.f32 %v318_v36, %v2242_v15 }
 0x130   : > { %v1420_v41 = vsel %vm1418_vm9, %v1413_v39, %v1415_v23  ;;  %v1419_v42 = vsel %vm1418_vm9, %v1411_v35, %v1413_v39 }
 0x131   : > { %1741 = vmatmul.msk.bf16.vlgmr.msrb.gmra.mxu0 %vm229_vm1, %v1740_v38  ;;  %1742 = vmatmul.msk.bf16.vlgmr.msrb.gmra.mxu1 %vm229_vm1, %v1740_v38  ;;  %v1429_v43 = vsel %vm233_vm0, %v1420_v41, 0  ;;  %v1417_v44 = vpop.permute.xlu0 %1416  ;;  %v1426_v45 = vsel %vm233_vm0, %v1419_v42, 0  ;;  %v412_v50 = vadd.f32 %v394_v40, %v319_v1 }
 0x132   : > { %v1421_v46 = vsel %vm1418_vm9, %v1415_v23, %v1417_v44  ;;  %1441 = vmatpush.bf16.msrb.mxu1 %v1426_v45 }
 0x133   : > { %1743 = vmatmul.msk.bf16.vlgmr.msrb.gmra.mxu2 %vm229_vm1, %v1740_v38  ;;  %v1432_v47 = vsel %vm233_vm0, %v1421_v46, 0 }
 0x134   : > { %1454 = vmatpush.bf16.msrb.mxu2 %v1429_v43  ;;  %1467 = vmatpush.bf16.msrb.mxu3 %v1432_v47 }
 0x135   : > { %v381_v48 = vpop.f32.mrf.mxu2 }
 0x136   : > { %v320_v49 = vpop.f32.mrf.mxu0  ;;  %v333_v51 = vpop.f32.mrf.mxu1  ;;  %v411_v2 = vadd.f32 %v381_v48, %v306_v60 }
 0x137   : > { %v1339_v52 = vpop.permute.xlu1 %1338  ;;  %v396_v53 = vpop.f32.mrf.mxu3 }
 0x138   : > { %v1342_v54 = vsel %vm1093_vm8, %v1337_v27, %v1339_v52 }
 0x139   : > { %v1353_v56 = vsel %vm233_vm0, %v1342_v54, 0 }
 0x13a   : > { %1388 = vmatpush.bf16.msrb.mxu0 %v1353_v56 }
 0x13b   : > { %1749 = vmatmul.msk.bf16.vlgmr.msra.gmra.mxu3 %vm229_vm1, %v1747_v55 }
 0x13d   : > { %v383_v57 = vpop.f32.mrf.mxu2 }
 0x13e   : > { %v407_v58 = vpop.f32.mrf.mxu0  ;;  %v460_v59 = vpop.f32.mrf.mxu1 }
 0x13f   : > { %v486_v62 = vpop.f32.mrf.mxu3  ;;  %v413_v3 = vadd.f32 %v407_v58, %v332_v61  ;;  %v2285_v4 = vadd.f32 %v460_v59, %v411_v2 }
 0x141   : > { %1745 = vmatmul.msk.bf16.vlgmr.msra.gmra.mxu0 %vm229_vm1, %v1739_v28  ;;  %1746 = vmatmul.msk.bf16.vlgmr.msra.gmra.mxu1 %vm229_vm1, %v1739_v28  ;;  %v2290_v6 = vadd.f32 %v486_v62, %v413_v3  ;;  %v503_v7 = vmul.f32 %v2287_v5, %v2285_v4 }
 0x143   : > { %1748 = vmatmul.msk.bf16.vlgmr.msra.gmra.mxu2 %vm229_vm1, %v1747_v55  ;;  %v505_v8 = vmul.f32 %v2292_v9, %v2290_v6  ;;  %v511_v18 = vmul.f32 %v503_v7, %v503_v7 }
 0x145   : > { %v513_v0 = vmul.f32 %v505_v8, %v505_v8 }
 0x146   : > { %v473_v11 = vpop.f32.mrf.mxu2  ;;  %v409_v12 = vpop.f32.mrf.mxu0 }
 0x147   : > { %v2298_v13 = vadd.f32 %v473_v11, %v412_v50  ;;  %v462_v14 = vpop.f32.mrf.mxu1  ;;  %v488_v15 = vpop.f32.mrf.mxu3 }
 0x149   : > { %v504_v17 = vmul.f32 %v2294_v10, %v2298_v13 }
 0x14b   : > { %v512_v19 = vmul.f32 %v504_v17, %v504_v17  ;;  %1754 = vmatmul.msk.bf16.vlgmr.msrb.gmra.mxu3 %vm229_vm1, %v1751_v16  ;;  %v506_v20 = vadd.f32 %v504_v17, %v503_v7 }
 0x14d   : > { %v507_v21 = vadd.f32 %v506_v20, %v505_v8  ;;  %v514_v22 = vadd.f32 %v512_v19, %v511_v18 }
 0x14e   : > { %v475_v23 = vpop.f32.mrf.mxu2  ;;  %v567_v24 = vpop.f32.mrf.mxu0 }
 0x14f   : > { %508 = vadd.xlane.f32.xlu0 %v507_v21  ;;  %v580_v25 = vpop.f32.mrf.mxu1  ;;  %v515_v26 = vadd.f32 %v514_v22, %v513_v0  ;;  %v638_v27 = vpop.f32.mrf.mxu3 }
 0x150   : > { %v639_v42 = vadd.f32 %v638_v27, %v567_v24 }
 0x151   : > { %516 = vadd.xlane.f32.xlu2 %v515_v26  ;;  %1750 = vmatmul.msk.bf16.vlgmr.msrb.gmra.mxu0 %vm229_vm1, %v1747_v55 }
 0x152   : > { %1752 = vmatmul.msk.bf16.vlgmr.msrb.gmra.mxu1 %vm229_vm1, %v1751_v16 }
 0x153   : > { %1753 = vmatmul.msk.bf16.vlgmr.msrb.gmra.mxu2 %vm229_vm1, %v1751_v16 }
 0x156   : > { %v593_v28 = vpop.f32.mrf.mxu2  ;;  %v569_v29 = vpop.f32.mrf.mxu0 }
 0x157   : > { %v582_v30 = vpop.f32.mrf.mxu1  ;;  %v640_v31 = vpop.f32.mrf.mxu3 }
 0x15e   : > { %v595_v32 = vpop.f32.mrf.mxu2  ;;  %v651_v33 = vpop.f32.mrf.mxu0 }
 0x15f   : > { %v664_v34 = vpop.f32.mrf.mxu1  ;;  %v726_v35 = vpop.f32.mrf.mxu3  ;;  %v652_v46 = vadd.f32 %v651_v33, %v580_v25 }
 0x160   : > { %v665_v43 = vadd.f32 %v664_v34, %v593_v28 }
 0x161   : > { %v744_v51 = vadd.f32 %v726_v35, %v652_v46 }
 0x166   : > { %v713_v36 = vpop.f32.mrf.mxu2  ;;  %v653_v37 = vpop.f32.mrf.mxu0 }
 0x167   : > { %v666_v38 = vpop.f32.mrf.mxu1  ;;  %v728_v39 = vpop.f32.mrf.mxu3  ;;  %v743_v47 = vadd.f32 %v713_v36, %v639_v42 }
 0x16e   : > { %v715_v40 = vpop.f32.mrf.mxu2  ;;  %v739_v41 = vpop.f32.mrf.mxu0 }
 0x16f   : > { %v792_v44 = vpop.f32.mrf.mxu1  ;;  %v818_v45 = vpop.f32.mrf.mxu3  ;;  %v745_v48 = vadd.f32 %v739_v41, %v665_v43 }
 0x170   : > { %v2311_v49 = vadd.f32 %v792_v44, %v743_v47 }
 0x171   : > { %v2313_v52 = vadd.f32 %v818_v45, %v745_v48 }
 0x172   : > { %v829_v55 = vmul.f32 %v2311_v49, %v2287_v5 }
 0x173   : > { %v831_v59 = vmul.f32 %v2313_v52, %v2292_v9 }
 0x174   : > { %v837_v61 = vmul.f32 %v829_v55, %v829_v55 }
 0x175   : > { %v839_v2 = vmul.f32 %v831_v59, %v831_v59 }
 0x176   : > { %v805_v53 = vpop.f32.mrf.mxu2  ;;  %v741_v54 = vpop.f32.mrf.mxu0 }
 0x177   : > { %v2317_v56 = vadd.f32 %v805_v53, %v744_v51  ;;  %v794_v57 = vpop.f32.mrf.mxu1  ;;  %v820_v58 = vpop.f32.mrf.mxu3 }
 0x179   : > { %v830_v60 = vmul.f32 %v2317_v56, %v2294_v10 }
 0x17b   : > { %v838_v62 = vmul.f32 %v830_v60, %v830_v60  ;;  %v832_v63 = vadd.f32 %v830_v60, %v829_v55 }
 0x17d   : > { %v833_v1 = vadd.f32 %v832_v63, %v831_v59  ;;  %v840_v3 = vadd.f32 %v838_v62, %v837_v61 }
 0x17e   : > { %v807_v50 = vpop.f32.mrf.mxu2  ;;  %v892_v11 = vpop.f32.mrf.mxu0 }
 0x17f   : > { %834 = vadd.xlane.f32.xlu1 %v833_v1  ;;  %v905_v12 = vpop.f32.mrf.mxu1  ;;  %v841_v7 = vadd.f32 %v840_v3, %v839_v2  ;;  %v963_v14 = vpop.f32.mrf.mxu3 }
 0x180   : > { %v964_v27 = vadd.f32 %v963_v14, %v892_v11 }
 0x181   : > { %842 = vadd.xlane.f32.xlu2 %v841_v7 }
 0x186   : > { %v918_v15 = vpop.f32.mrf.mxu2  ;;  %v894_v16 = vpop.f32.mrf.mxu0 }
 0x187   : > { %v907_v8 = vpop.f32.mrf.mxu1  ;;  %v965_v17 = vpop.f32.mrf.mxu3 }
 0x18e   : > { %v920_v18 = vpop.f32.mrf.mxu2  ;;  %v976_v19 = vpop.f32.mrf.mxu0 }
 0x18f   : > { %v989_v20 = vpop.f32.mrf.mxu1  ;;  %v1052_v21 = vpop.f32.mrf.mxu3  ;;  %v977_v31 = vadd.f32 %v976_v19, %v905_v12 }
 0x190   : > { %v990_v28 = vadd.f32 %v989_v20, %v918_v15 }
 0x191   : > { %v1070_v35 = vadd.f32 %v1052_v21, %v977_v31 }
 0x196   : > { %v1039_v0 = vpop.f32.mrf.mxu2  ;;  %v978_v22 = vpop.f32.mrf.mxu0 }
 0x197   : > { %v991_v23 = vpop.f32.mrf.mxu1  ;;  %v1054_v24 = vpop.f32.mrf.mxu3  ;;  %v1069_v32 = vadd.f32 %v1039_v0, %v964_v27 }
 0x19e   : > { %v1041_v25 = vpop.f32.mrf.mxu2  ;;  %v1065_v26 = vpop.f32.mrf.mxu0 }
 0x19f   : > { %v1118_v29 = vpop.f32.mrf.mxu1  ;;  %v1144_v30 = vpop.f32.mrf.mxu3  ;;  %v1071_v33 = vadd.f32 %v1065_v26, %v990_v28 }
 0x1a0   : > { %v2323_v34 = vadd.f32 %v1118_v29, %v1069_v32 }
 0x1a1   : > { %v2325_v36 = vadd.f32 %v1144_v30, %v1071_v33 }
 0x1a2   : > { %v1155_v39 = vmul.f32 %v2323_v34, %v2287_v5 }
 0x1a3   : > { %v1157_v43 = vmul.f32 %v2325_v36, %v2292_v9 }
 0x1a4   : > { %v1163_v45 = vmul.f32 %v1155_v39, %v1155_v39 }
 0x1a5   : > { %v1165_v51 = vmul.f32 %v1157_v43, %v1157_v43 }
 0x1a6   : > { %v1131_v37 = vpop.f32.mrf.mxu2  ;;  %v1067_v38 = vpop.f32.mrf.mxu0 }
 0x1a7   : > { %v2329_v40 = vadd.f32 %v1131_v37, %v1070_v35  ;;  %v1120_v41 = vpop.f32.mrf.mxu1  ;;  %v1146_v42 = vpop.f32.mrf.mxu3 }
 0x1a9   : > { %v1156_v44 = vmul.f32 %v2329_v40, %v2294_v10 }
 0x1ab   : > { %v1164_v46 = vmul.f32 %v1156_v44, %v1156_v44  ;;  %v1158_v47 = vadd.f32 %v1156_v44, %v1155_v39 }
 0x1ad   : > { %v1159_v48 = vadd.f32 %v1158_v47, %v1157_v43  ;;  %v1166_v53 = vadd.f32 %v1164_v46, %v1163_v45 }
 0x1ae   : > { %v1133_v54 = vpop.f32.mrf.mxu2  ;;  %v1218_v55 = vpop.f32.mrf.mxu0 }
 0x1af   : > { %1160 = vadd.xlane.f32.xlu0 %v1159_v48  ;;  %v1231_v57 = vpop.f32.mrf.mxu1  ;;  %v1167_v58 = vadd.f32 %v1166_v53, %v1165_v51  ;;  %v1289_v59 = vpop.f32.mrf.mxu3 }
 0x1b0   : > { %v1290_v8 = vadd.f32 %v1289_v59, %v1218_v55 }
 0x1b1   : > { %1168 = vadd.xlane.f32.xlu1 %v1167_v58 }
 0x1b6   : > { %v1244_v60 = vpop.f32.mrf.mxu2  ;;  %v1220_v61 = vpop.f32.mrf.mxu0 }
 0x1b7   : > { %v1233_v62 = vpop.f32.mrf.mxu1  ;;  %v1291_v63 = vpop.f32.mrf.mxu3 }
 0x1be   : > { %v1246_v1 = vpop.f32.mrf.mxu2  ;;  %v1302_v2 = vpop.f32.mrf.mxu0 }
 0x1bf   : > { %v1315_v3 = vpop.f32.mrf.mxu1  ;;  %v1377_v50 = vpop.f32.mrf.mxu3  ;;  %v1303_v20 = vadd.f32 %v1302_v2, %v1231_v57 }
 0x1c0   : > { %v1316_v17 = vadd.f32 %v1315_v3, %v1244_v60 }
 0x1c1   : > { %v1395_v23 = vadd.f32 %v1377_v50, %v1303_v20 }
 0x1c2   : > { %v509_v44 = vpop.xlane.xlu0 %508 }
 0x1c6   : > { %v1364_v11 = vpop.f32.mrf.mxu2  ;;  %v1304_v12 = vpop.f32.mrf.mxu0 }
 0x1c7   : > { %v1317_v7 = vpop.f32.mrf.mxu1  ;;  %v1379_v14 = vpop.f32.mrf.mxu3  ;;  %v1394_v21 = vadd.f32 %v1364_v11, %v1290_v8 }
 0x1ce   : > { %v1366_v15 = vpop.f32.mrf.mxu2  ;;  %v1390_v16 = vpop.f32.mrf.mxu0 }
 0x1cf   : > { %v1443_v18 = vpop.f32.mrf.mxu1  ;;  %v1469_v19 = vpop.f32.mrf.mxu3  ;;  %v1396_v0 = vadd.f32 %v1390_v16, %v1316_v17 }
 0x1d0   : > { %v2335_v22 = vadd.f32 %v1443_v18, %v1394_v21 }
 0x1d1   : > { %v2337_v24 = vadd.f32 %v1469_v19, %v1396_v0 }
 0x1d2   : > { %v1480_v27 = vmul.f32 %v2335_v22, %v2287_v5  ;;  %v517_v5 = vpop.xlane.xlu2 %516 }
 0x1d3   : > { %v1482_v31 = vmul.f32 %v2337_v24, %v2292_v9 }
 0x1d4   : > { %v1488_v33 = vmul.f32 %v1480_v27, %v1480_v27 }
 0x1d5   : > { %v1490_v39 = vmul.f32 %v1482_v31, %v1482_v31 }
 0x1d6   : > { %v1456_v25 = vpop.f32.mrf.mxu2  ;;  %v1392_v26 = vpop.f32.mrf.mxu0 }
 0x1d7   : > { %v2341_v28 = vadd.f32 %v1456_v25, %v1395_v23  ;;  %v1445_v29 = vpop.f32.mrf.mxu1  ;;  %v1471_v30 = vpop.f32.mrf.mxu3 }
 0x1d9   : > { %v1481_v32 = vmul.f32 %v2341_v28, %v2294_v10 }
 0x1db   : > { %v1489_v35 = vmul.f32 %v1481_v32, %v1481_v32  ;;  %v1483_v37 = vadd.f32 %v1481_v32, %v1480_v27 }
 0x1dd   : > { %v1484_v38 = vadd.f32 %v1483_v37, %v1482_v31  ;;  %v1491_v41 = vadd.f32 %v1489_v35, %v1488_v33 }
 0x1de   : > { %v1458_v42 = vpop.f32.mrf.mxu2 }
 0x1df   : > { %1485 = vadd.xlane.f32.xlu2 %v1484_v38  ;;  %v1492_v43 = vadd.f32 %v1491_v41, %v1490_v39 }
 0x1e1   : > { %1493 = vadd.xlane.f32.xlu0 %v1492_v43 }
 0x1f2   : > { %v835_v45 = vpop.xlane.xlu1 %834 }
 0x1f3   : > { %v836_v48 = vadd.f32 %v835_v45, %v509_v44 }
 0x1f4   : > { %v843_v46 = vpop.xlane.xlu2 %842 }
 0x1f5   : > { %v844_v51 = vadd.f32 %v843_v46, %v517_v5 }
 0x222   : > { %v1161_v47 = vpop.xlane.xlu0 %1160 }
 0x223   : > { %v1162_v53 = vadd.f32 %v1161_v47, %v836_v48 }
 0x224   : > { %v1169_v9 = vpop.xlane.xlu1 %1168 }
 0x225   : > { %v1170_v54 = vadd.f32 %v1169_v9, %v844_v51 }
 0x252   : > { %v1486_v10 = vpop.xlane.xlu2 %1485 }
 0x253   : > { %v1487_v55 = vadd.f32 %v1486_v10, %v1162_v53 }
 0x254   : > { %v1494_v57 = vpop.xlane.xlu0 %1493 }
 0x255   : > { %v1496_v58 = vmul.f32 0.0009765625, %v1487_v55  ;;  %v1495_v59 = vadd.f32 %v1494_v57, %v1170_v54 }
 0x257   : > { %v1498_v60 = vmul.f32 %v1496_v58, %v1496_v58  ;;  %v1497_v61 = vmul.f32 0.0009765625, %v1495_v59  ;;  %v1514_v12 = vsub.f32 %v2285_v4, %v1496_v58  ;;  %v1515_v7 = vsub.f32 %v2298_v13, %v1496_v58 }
 0x258   : > { %v1516_v14 = vsub.f32 %v2290_v6, %v1496_v58  ;;  %v1530_v16 = vsub.f32 %v2311_v49, %v1496_v58  ;;  %v1531_v8 = vsub.f32 %v2317_v56, %v1496_v58  ;;  %v1532_v17 = vsub.f32 %v2313_v52, %v1496_v58 }
 0x259   : > { %v1499_v62 = vsub.f32 %v1497_v61, %v1498_v60  ;;  %v1547_v18 = vsub.f32 %v2323_v34, %v1496_v58  ;;  %v1548_v19 = vsub.f32 %v2329_v40, %v1496_v58  ;;  %v1549_v4 = vsub.f32 %v2325_v36, %v1496_v58 }
 0x25a   : > { %v1564_v6 = vsub.f32 %v2335_v22, %v1496_v58  ;;  %v1565_v13 = vsub.f32 %v2341_v28, %v1496_v58  ;;  %v1566_v49 = vsub.f32 %v2337_v24, %v1496_v58 }
 0x25b   : > { %v1500_v63 = vadd.f32 1e-05, %v1499_v62 }
 0x25d   : > { %1832 = vrsqrt.f32 %v1500_v63  ;;  %vm1507_vm11 = vweird.f32 %v1500_v63 }
 0x263   : > { %v1833_v1 = vpop.eup %1832 }
 0x264   : > { %v1502_v2 = vmul.f32 %v1833_v1, %v1500_v63  ;;  %vm1508_vm10 = vweird.f32 %v1833_v1 }
 0x265   : > { %vm1509_vm12 = vmor %vm1507_vm11, %vm1508_vm10 }
 0x266   : > { %v1503_v3 = vmul.f32 %v1833_v1, %v1502_v2 }
 0x268   : > { %v1504_v50 = vmul.f32 0.5, %v1503_v3 }
 0x26a   : > { %v1505_v11 = vsub.f32 1.5, %v1504_v50 }
 0x26c   : > { %v1506_v15 = vmul.f32 %v1833_v1, %v1505_v11 }
 0x26e   : > { %v1510_v20 = vsel %vm1509_vm12, %v1833_v1, %v1506_v15 }
 0x26f   : > { %v1517_v21 = vmul.f32 %v1514_v12, %v1510_v20  ;;  %v1518_v56 = vmul.f32 %v1515_v7, %v1510_v20  ;;  %v1519_v0 = vmul.f32 %v1516_v14, %v1510_v20  ;;  %v1533_v23 = vmul.f32 %v1530_v16, %v1510_v20 }
 0x270   : > { %v1534_v52 = vmul.f32 %v1531_v8, %v1510_v20  ;;  %v1535_v34 = vmul.f32 %v1532_v17, %v1510_v20  ;;  %v1550_v25 = vmul.f32 %v1547_v18, %v1510_v20  ;;  %v1551_v40 = vmul.f32 %v1548_v19, %v1510_v20 }
 0x271   : > { %v1520_v26 = vmax.f32 %v1517_v21, 0.0  ;;  %v1521_v36 = vmax.f32 %v1518_v56, 0.0  ;;  %v1522_v27 = vmax.f32 %v1519_v0, 0.0  ;;  %v1536_v29 = vmax.f32 %v1533_v23, 0.0 }
 0x272   : > { %v1537_v30 = vmax.f32 %v1534_v52, 0.0  ;;  %v1538_v31 = vmax.f32 %v1535_v34, 0.0  ;;  %v1552_v22 = vmul.f32 %v1549_v4, %v1510_v20  ;;  %v1553_v32 = vmax.f32 %v1550_v25, 0.0 }
 0x273   : > { %v1523_v28 = vpack.c.bf16 %v1521_v36, %v1520_v26  ;;  %v1524_v33 = vpack.c.bf16 %v1522_v27, %v1522_v27  ;;  %v1554_v24 = vmax.f32 %v1551_v40, 0.0  ;;  %v1567_v35 = vmul.f32 %v1564_v6, %v1510_v20 }
 0x274   : > { %v1539_v37 = vpack.c.bf16 %v1537_v30, %v1536_v29  ;;  %v1540_v38 = vpack.c.bf16 %v1538_v31, %v1538_v31  ;;  %v1555_v39 = vmax.f32 %v1552_v22, 0.0  ;;  %v1568_v41 = vmul.f32 %v1565_v13, %v1510_v20 }
 0x275   : > { %1525 = vst [vmem:[%s190_s27] sm:$0xff] %v1523_v28  ;;  %v1556_v42 = vpack.c.bf16 %v1554_v24, %v1553_v32  ;;  %v1569_v43 = vmul.f32 %v1566_v49, %v1510_v20  ;;  %v1570_v5 = vmax.f32 %v1567_v35, 0.0 }
 0x276   : > { %1526 = vst [vmem:[%s190_s27 + $0x8] sm:$0xf] %v1524_v33  ;;  %v1557_v44 = vpack.c.bf16 %v1555_v39, %v1555_v39  ;;  %v1571_v45 = vmax.f32 %v1568_v41, 0.0 }
 0x277   : > { %1755 = vst [vmem:[%s190_s27 + $0xc] sm:$0xff] %v1539_v37  ;;  %v1572_v46 = vmax.f32 %v1569_v43, 0.0 }
 0x278   : > { %1756 = vst [vmem:[%s190_s27 + $0x14] sm:$0xf] %v1540_v38  ;;  %v1573_v47 = vpack.c.bf16 %v1571_v45, %v1570_v5 }
 0x279   : > { %1757 = vst [vmem:[%s190_s27 + $0x18] sm:$0xff] %v1556_v42  ;;  %v1574_v48 = vpack.c.bf16 %v1572_v46, %v1572_v46 }
 0x27a   : > { %1758 = vst [vmem:[%s190_s27 + $0x20] sm:$0xf] %v1557_v44 }
 0x27b   : > { %1759 = vst [vmem:[%s190_s27 + $0x24] sm:$0xff] %v1573_v47 }
 0x27c   : > { %1760 = vst [vmem:[%s190_s27 + $0x2c] sm:$0xf] %v1574_v48 }
 0x27d   : > { %1861 = shalt.err (!%p1858_p5)
}
 0x27e   : > { %s1922_s11 = smov 192   ;;  %s1923_s18 = smov 12  }
 0x27f   : > { %1767 = dma.vmem_to_hbm [thread:$0]  (%p1984_p4), %s1594_s28, 768, %s1596_s29, %s1579_s30, %s1922_s11, %s1922_s11, %s1923_s18  }
 0x280 PF: > { %p1773_p6 = scmp.ge.s32.totalorder %s1912_s17, 2  ;;  %s1610_s19 = sand.u32 1, %s1892_s12  }
 0x281   : > { %s1611_s21 = scalar_lea.sflag [#allocation4], %s1610_s19 }
 0x282   : > { %p1770_p7 = pnand %p1773_p6, %p1991_p8 }
 0x284   : > { %p1771_p9 = pneg %p1770_p7 }
 0x286   : > { %1887 = dma.done.wait (%p1771_p9), %s1611_s21, 768  }
 0x287   : > { %1889 = vsyncadd (%p1771_p9), %s1611_s21, 4294966528  ;;  %s16_s17 = sadd.s32 1, %s1912_s17   ;;  %s2406_s12 = smov %s1896_s13 }
 0x288   : > { %p13_p10 = scmp.ge.s32.totalorder %s16_s17, 4   ;;  %s2407_s13 = smov %s1900_s14 }
 0x289   : > { %s2408_s14 = smov %s1997_s25  ;;  %s2409_s15 = smov %s1908_s16 }
 0x28a   : > { %s2410_s16 = smov %s2412_s20  ;;  %15 = sbr.rel (!%p13_p10) target bundleno = 4 (0x4), region = 91 }
 0x28f   :  { %1617 = vsyncpa [#allocation4], 1 }
 0x290   :  { %1619 = vsyncpa [#allocation4 + $0x1], 1 }

</bundles_post_ra>
